<compile_context>
chip_gen: v7x
topology: tpu7x:2x2x1
jax: 0.10.0
libtpu: 0.0.40
codegen_flags: <defaults>
</compile_context>

<pallas_src>
import functools
import math

import jax
import jax.numpy as jnp
from jax.experimental import pallas as pl
from jax.experimental.pallas import tpu as pltpu

_VMEM = pl.BlockSpec(memory_space=pltpu.MemorySpace.VMEM)


# ------------------------------ fused kernel -------------------------------- #

def _fused_forward_kernel(feats_ref, lin1_w_ref, lin1_shift_ref,
                          wqkv_ref, bqkv_ref, wo3_ref,
                          wff1_ref, bff1_ref, wff2_ref, evecs_ref,
                          lin2_w_ref, lin2_b_ref, o_ref,
                          *, nhead, nlayers, ln_eps):
    # linear1 (+ folded eval BatchNorm) + ReLU
    x = feats_ref[...]                                                  # (S, D)
    h = jnp.dot(x, lin1_w_ref[...], preferred_element_type=jnp.float32)
    h = jnp.maximum(h + lin1_shift_ref[...], 0.0)                       # (S, E)

    S, E = h.shape
    hd = E // nhead
    scale = 1.0 / math.sqrt(hd)

    def layernorm(y, g, b):
        mean = jnp.mean(y, axis=-1, keepdims=True)
        cy = y - mean
        var = jnp.mean(cy * cy, axis=-1, keepdims=True)
        return cy * jax.lax.rsqrt(var + ln_eps) * g + b

    for l in range(nlayers):                       # nlayers is small & static
        evecs = evecs_ref[l]                       # (6, E)
        bo    = evecs[0:1, :]
        ln1_g = evecs[1:2, :]
        ln1_b = evecs[2:3, :]
        bff2  = evecs[3:4, :]
        ln2_g = evecs[4:5, :]
        ln2_b = evecs[5:6, :]

        # ---- multi-head self-attention: one batched QKV projection ----------
        # batch axis = 3*nhead (q-heads, k-heads, v-heads stacked)
        hb = jnp.broadcast_to(h[None, :, :], (3 * nhead, S, E))
        qkv = jnp.einsum('bse,bef->bsf', hb, wqkv_ref[l],
                         preferred_element_type=jnp.float32) + bqkv_ref[l]
        q = qkv[0 * nhead:1 * nhead]               # (H, S, hd)
        k = qkv[1 * nhead:2 * nhead]
        v = qkv[2 * nhead:3 * nhead]

        # scores: contract head-dim directly (no materialized K transpose)
        s = jnp.einsum('hqd,hkd->hqk', q, k,
                       preferred_element_type=jnp.float32) * scale      # (H,S,S)
        s = s - jnp.max(s, axis=-1, keepdims=True)
        p = jnp.exp(s)
        p = p * pl.reciprocal(jnp.sum(p, axis=-1, keepdims=True), approx=True)

        ctx = jnp.einsum('hqk,hkd->hqd', p, v,
                         preferred_element_type=jnp.float32)            # (H,S,hd)
        # output projection: per-head matmul then sum over heads
        #   == concat(heads) @ Wo  (wo3[h] = Wo[h*hd:(h+1)*hd, :])
        sa = jnp.einsum('hqd,hde->hqe', ctx, wo3_ref[l],
                        preferred_element_type=jnp.float32)             # (H,S,E)
        sa = jnp.sum(sa, axis=0) + bo                                   # (S, E)

        h = layernorm(h + sa, ln1_g, ln1_b)

        # ---- feed-forward (relu) --------------------------------------------
        ff = jnp.dot(h, wff1_ref[l], preferred_element_type=jnp.float32)
        ff = jnp.maximum(ff + bff1_ref[l], 0.0)
        ff = jnp.dot(ff, wff2_ref[l], preferred_element_type=jnp.float32) + bff2
        h = layernorm(h + ff, ln2_g, ln2_b)

    # linear2 + tanh
    o_ref[...] = jnp.tanh(
        jnp.dot(h, lin2_w_ref[...], preferred_element_type=jnp.float32)
        + lin2_b_ref[...])


# ------------------------------ wrapper -------------------------------------- #

def embedding_model_forward(feats, packed, nhead):
    # TODO(synk): self.base_model (fast_MPN_COV_wrapper resnet18 + CBP pooling) is
    # an external dependency with no definition in the source; this forward starts
    # from its (batch, cont_dims) feature output.
    nlayers = packed["wqkv"].shape[0]
    kern = functools.partial(_fused_forward_kernel,
                             nhead=nhead, nlayers=nlayers, ln_eps=1e-5)
    args = (feats, packed["lin1_w"], packed["lin1_shift"],
            packed["wqkv"], packed["bqkv"], packed["wo3"],
            packed["wff1"], packed["bff1"], packed["wff2"], packed["evecs"],
            packed["lin2_w"], packed["lin2_b"])
    out_shape = (feats.shape[0], packed["lin2_w"].shape[1])
    return pl.pallas_call(
        kern,
        out_shape=jax.ShapeDtypeStruct(out_shape, jnp.float32),
        in_specs=[_VMEM] * len(args),
        out_specs=_VMEM,
    )(*args)


# ----------------- host-side packing of PyTorch-style params ----------------- #

def pack_params(params, nhead):
    """Fold BN into linear1 and split attention weights per head (host side)."""
    E = params["lin1_w"].shape[1]
    hd = E // nhead

    lin1_w = params["lin1_w"] * params["bn_scale"][None, :]
    lin1_shift = (params["lin1_b"] * params["bn_scale"] + params["bn_shift"])[None, :]

    def split_w(w):                       # (E, E) -> (H, E, hd)
        return jnp.transpose(w.reshape(E, nhead, hd), (1, 0, 2))

    def split_b(b):                       # (E,) -> (H, 1, hd)
        return b.reshape(nhead, hd)[:, None, :]

    wqkv, bqkv, wo3, wff1, bff1, wff2, evecs = [], [], [], [], [], [], []
    for p in params["layers"]:
        wqkv.append(jnp.concatenate(
            [split_w(p["wq"]), split_w(p["wk"]), split_w(p["wv"])], axis=0))
        bqkv.append(jnp.concatenate(
            [split_b(p["bq"]), split_b(p["bk"]), split_b(p["bv"])], axis=0))
        wo3.append(p["wo"].reshape(nhead, hd, E))
        wff1.append(p["w_ff1"])
        bff1.append(p["b_ff1"][None, :])
        wff2.append(p["w_ff2"])
        evecs.append(jnp.stack([p["bo"], p["ln1_g"], p["ln1_b"],
                                p["b_ff2"], p["ln2_g"], p["ln2_b"]], axis=0))

    stack = lambda xs: jnp.stack(xs, axis=0)
    return dict(
        lin1_w=lin1_w, lin1_shift=lin1_shift,
        wqkv=stack(wqkv), bqkv=stack(bqkv), wo3=stack(wo3),
        wff1=stack(wff1), bff1=stack(bff1), wff2=stack(wff2),
        evecs=stack(evecs),
        lin2_w=params["lin2_w"], lin2_b=params["lin2_b"][None, :],
    )


# ------------------------ deterministic parameters --------------------------- #

def init_params(key, cont_dims, middle, d_ff, nlayers, bn_eps=1e-5):
    keys = iter(jax.random.split(key, 64))

    def w(shape, scale=0.05):
        return scale * jax.random.normal(next(keys), shape, dtype=jnp.float32)

    gamma = 1.0 + 0.1 * jax.random.normal(next(keys), (middle,), dtype=jnp.float32)
    beta = 0.1 * jax.random.normal(next(keys), (middle,), dtype=jnp.float32)
    run_mean = 0.1 * jax.random.normal(next(keys), (middle,), dtype=jnp.float32)
    run_var = 1.0 + 0.1 * jnp.abs(
        jax.random.normal(next(keys), (middle,), dtype=jnp.float32))
    bn_scale = gamma * jax.lax.rsqrt(run_var + bn_eps)
    bn_shift = beta - run_mean * bn_scale

    layers = []
    for _ in range(nlayers):
        layers.append(dict(
            wq=w((middle, middle)), wk=w((middle, middle)), wv=w((middle, middle)),
            bq=w((middle,)), bk=w((middle,)), bv=w((middle,)),
            wo=w((middle, middle)), bo=w((middle,)),
            ln1_g=jnp.ones((middle,), jnp.float32),
            ln1_b=jnp.zeros((middle,), jnp.float32),
            w_ff1=w((middle, d_ff)), b_ff1=w((d_ff,)),
            w_ff2=w((d_ff, middle)), b_ff2=w((middle,)),
            ln2_g=jnp.ones((middle,), jnp.float32),
            ln2_b=jnp.zeros((middle,), jnp.float32),
        ))

    return dict(
        lin1_w=w((cont_dims, middle)), lin1_b=w((middle,)),
        bn_scale=bn_scale, bn_shift=bn_shift,
        layers=layers,
        lin2_w=w((middle, cont_dims)), lin2_b=w((cont_dims,)),
    )


# ----------------------------- pure-JAX reference ----------------------------- #

def reference_forward(feats, params, nhead):
    def lin(x, w, b):
        return jnp.dot(x, w, preferred_element_type=jnp.float32) + b

    def layernorm(x, g, b, eps=1e-5):
        mean = jnp.mean(x, axis=-1, keepdims=True)
        cx = x - mean
        var = jnp.mean(cx * cx, axis=-1, keepdims=True)
        return cx * jax.lax.rsqrt(var + eps) * g + b

    h = lin(feats, params["lin1_w"], params["lin1_b"])
    h = jnp.maximum(h * params["bn_scale"] + params["bn_shift"], 0.0)
    for p in params["layers"]:
        E = h.shape[-1]
        hd = E // nhead
        q = lin(h, p["wq"], p["bq"])
        k = lin(h, p["wk"], p["bk"])
        v = lin(h, p["wv"], p["bv"])
        heads = []
        for i in range(nhead):
            sl = slice(i * hd, (i + 1) * hd)
            s = jnp.dot(q[:, sl], k[:, sl].T) / math.sqrt(hd)
            heads.append(jax.nn.softmax(s, axis=-1) @ v[:, sl])
        sa = jnp.concatenate(heads, axis=-1) @ p["wo"] + p["bo"]
        h = layernorm(h + sa, p["ln1_g"], p["ln1_b"])
        ff = jnp.maximum(lin(h, p["w_ff1"], p["b_ff1"]), 0.0)
        ff = lin(ff, p["w_ff2"], p["b_ff2"])
        h = layernorm(h + ff, p["ln2_g"], p["ln2_b"])
    return jnp.tanh(lin(h, params["lin2_w"], params["lin2_b"]))


# ----------------------------------- main ------------------------------------- #

if __name__ == "__main__":
    B = 8          # batch (also the attention sequence length for 2-D input)
    CONT = 64      # cont_dims / d_model (scaled down from 2048)
    MID = 32       # middle (scaled down from 1000)
    DFF = 128      # TransformerEncoderLayer dim_feedforward (scaled from 2048)
    NHEAD = 4
    NLAYERS = 2

    key = jax.random.PRNGKey(0)
    pkey, xkey = jax.random.split(key)
    params = init_params(pkey, CONT, MID, DFF, NLAYERS)
    feats = jax.random.normal(xkey, (B, CONT), dtype=jnp.float32)

    packed = pack_params(params, NHEAD)
    out = jax.block_until_ready(embedding_model_forward(feats, packed, NHEAD))
    ref = jax.block_until_ready(reference_forward(feats, params, NHEAD))

    assert out.shape == (B, CONT) and out.dtype == jnp.float32
    if not bool(jnp.allclose(out, ref, atol=5e-3, rtol=5e-3)):
        raise AssertionError(
            f"mismatch vs reference, max abs err = {float(jnp.max(jnp.abs(out - ref)))}")
    print("KERNEL_OK")
</pallas_src>

<mosaic_0001>
module attributes {stable_mosaic.version = 11 : i64} {
  func.func @_fused_forward_kernel(%arg0: memref<8x64xf32, #tpu.memory_space<vmem>>, %arg1: memref<64x32xf32, #tpu.memory_space<vmem>>, %arg2: memref<1x32xf32, #tpu.memory_space<vmem>>, %arg3: memref<2x12x32x8xf32, #tpu.memory_space<vmem>>, %arg4: memref<2x12x1x8xf32, #tpu.memory_space<vmem>>, %arg5: memref<2x4x8x32xf32, #tpu.memory_space<vmem>>, %arg6: memref<2x32x128xf32, #tpu.memory_space<vmem>>, %arg7: memref<2x1x128xf32, #tpu.memory_space<vmem>>, %arg8: memref<2x128x32xf32, #tpu.memory_space<vmem>>, %arg9: memref<2x6x32xf32, #tpu.memory_space<vmem>>, %arg10: memref<32x64xf32, #tpu.memory_space<vmem>>, %arg11: memref<1x64xf32, #tpu.memory_space<vmem>>, %arg12: memref<8x64xf32, #tpu.memory_space<vmem>>) attributes {dimension_semantics = [], scalar_prefetch = 0 : i64, scratch_operands = 0 : i64, tpu.core_type = #tpu.core_type<tc>} {
    %c0 = arith.constant 0 : index
    %c0_0 = arith.constant 0 : index
    %0 = vector.load %arg0[%c0, %c0_0] : memref<8x64xf32, #tpu.memory_space<vmem>>, vector<8x64xf32>
    %c0_1 = arith.constant 0 : index
    %c0_2 = arith.constant 0 : index
    %1 = vector.load %arg1[%c0_1, %c0_2] : memref<64x32xf32, #tpu.memory_space<vmem>>, vector<64x32xf32>
    %cst = arith.constant dense<0.000000e+00> : vector<8x32xf32>
    %2 = tpu.matmul %0, %1, %cst {dimension_numbers = #tpu.dot_dimension_numbers<[1], [0], [0], [1], [0, 0, 1, 1], [], []>} : vector<8x64xf32>, vector<64x32xf32>, vector<8x32xf32> -> vector<8x32xf32>
    %c0_3 = arith.constant 0 : index
    %c0_4 = arith.constant 0 : index
    %3 = vector.load %arg2[%c0_3, %c0_4] : memref<1x32xf32, #tpu.memory_space<vmem>>, vector<1x32xf32>
    %4 = vector.broadcast %3 : vector<1x32xf32> to vector<8x32xf32>
    %5 = arith.addf %2, %4 : vector<8x32xf32>
    %cst_5 = arith.constant 0.000000e+00 : f32
    %6 = vector.broadcast %cst_5 : f32 to vector<8x32xf32>
    %7 = arith.maximumf %5, %6 : vector<8x32xf32>
    %c0_6 = arith.constant 0 : index
    %c0_7 = arith.constant 0 : index
    %c0_8 = arith.constant 0 : index
    %8 = vector.load %arg9[%c0_6, %c0_7, %c0_8] : memref<2x6x32xf32, #tpu.memory_space<vmem>>, vector<1x6x32xf32>
    %9 = vector.shape_cast %8 : vector<1x6x32xf32> to vector<6x32xf32>
    %10 = vector.extract_strided_slice %9 {offsets = [0, 0], sizes = [1, 32], strides = [1, 1]} : vector<6x32xf32> to vector<1x32xf32>
    %11 = vector.extract_strided_slice %9 {offsets = [1, 0], sizes = [1, 32], strides = [1, 1]} : vector<6x32xf32> to vector<1x32xf32>
    %12 = vector.extract_strided_slice %9 {offsets = [2, 0], sizes = [1, 32], strides = [1, 1]} : vector<6x32xf32> to vector<1x32xf32>
    %13 = vector.extract_strided_slice %9 {offsets = [3, 0], sizes = [1, 32], strides = [1, 1]} : vector<6x32xf32> to vector<1x32xf32>
    %14 = vector.extract_strided_slice %9 {offsets = [4, 0], sizes = [1, 32], strides = [1, 1]} : vector<6x32xf32> to vector<1x32xf32>
    %15 = vector.extract_strided_slice %9 {offsets = [5, 0], sizes = [1, 32], strides = [1, 1]} : vector<6x32xf32> to vector<1x32xf32>
    %16 = vector.shape_cast %7 : vector<8x32xf32> to vector<1x8x32xf32>
    %17 = vector.shape_cast %16 : vector<1x8x32xf32> to vector<1x8x32xf32>
    %18 = vector.broadcast %17 : vector<1x8x32xf32> to vector<12x8x32xf32>
    %c0_9 = arith.constant 0 : index
    %c0_10 = arith.constant 0 : index
    %c0_11 = arith.constant 0 : index
    %c0_12 = arith.constant 0 : index
    %19 = vector.load %arg3[%c0_9, %c0_10, %c0_11, %c0_12] : memref<2x12x32x8xf32, #tpu.memory_space<vmem>>, vector<1x12x32x8xf32>
    %20 = vector.shape_cast %19 : vector<1x12x32x8xf32> to vector<12x32x8xf32>
    "tpu.trace_start"() <{level = 10 : i32, message = "bse,bef->bsf"}> : () -> ()
    %cst_13 = arith.constant dense<0.000000e+00> : vector<12x8x8xf32>
    %21 = tpu.matmul %18, %20, %cst_13 {dimension_numbers = #tpu.dot_dimension_numbers<[2], [1], [1], [2], [0, 0, 0, 1, 1, 2], [0], [0]>} : vector<12x8x32xf32>, vector<12x32x8xf32>, vector<12x8x8xf32> -> vector<12x8x8xf32>
    "tpu.trace_stop"() : () -> ()
    %c0_14 = arith.constant 0 : index
    %c0_15 = arith.constant 0 : index
    %c0_16 = arith.constant 0 : index
    %c0_17 = arith.constant 0 : index
    %22 = vector.load %arg4[%c0_14, %c0_15, %c0_16, %c0_17] : memref<2x12x1x8xf32, #tpu.memory_space<vmem>>, vector<1x12x1x8xf32>
    %23 = vector.shape_cast %22 : vector<1x12x1x8xf32> to vector<12x1x8xf32>
    %24 = vector.broadcast %23 : vector<12x1x8xf32> to vector<12x8x8xf32>
    %25 = arith.addf %21, %24 : vector<12x8x8xf32>
    %26 = vector.extract_strided_slice %25 {offsets = [0, 0, 0], sizes = [4, 8, 8], strides = [1, 1, 1]} : vector<12x8x8xf32> to vector<4x8x8xf32>
    %27 = vector.extract_strided_slice %25 {offsets = [4, 0, 0], sizes = [4, 8, 8], strides = [1, 1, 1]} : vector<12x8x8xf32> to vector<4x8x8xf32>
    %28 = vector.extract_strided_slice %25 {offsets = [8, 0, 0], sizes = [4, 8, 8], strides = [1, 1, 1]} : vector<12x8x8xf32> to vector<4x8x8xf32>
    "tpu.trace_start"() <{level = 10 : i32, message = "hqd,hkd->hqk"}> : () -> ()
    %cst_18 = arith.constant dense<0.000000e+00> : vector<4x8x8xf32>
    %29 = tpu.matmul %26, %27, %cst_18 {dimension_numbers = #tpu.dot_dimension_numbers<[2], [2], [1], [1], [0, 0, 0, 1, 1, 1], [0], [0]>} : vector<4x8x8xf32>, vector<4x8x8xf32>, vector<4x8x8xf32> -> vector<4x8x8xf32>
    "tpu.trace_stop"() : () -> ()
    %cst_19 = arith.constant 0.353553385 : f32
    %30 = vector.broadcast %cst_19 : f32 to vector<4x8x8xf32>
    %31 = arith.mulf %29, %30 : vector<4x8x8xf32>
    %cst_20 = arith.constant dense<0xFF800000> : vector<4x8xf32>
    %32 = vector.multi_reduction <maximumf>, %31, %cst_20 [2] : vector<4x8x8xf32> to vector<4x8xf32>
    %33 = vector.shape_cast %32 : vector<4x8xf32> to vector<4x8x1xf32>
    %34 = vector.broadcast %33 : vector<4x8x1xf32> to vector<4x8x8xf32>
    %35 = arith.subf %31, %34 : vector<4x8x8xf32>
    %36 = math.exp %35 : vector<4x8x8xf32>
    %cst_21 = arith.constant dense<0.000000e+00> : vector<4x8xf32>
    %37 = vector.multi_reduction <add>, %36, %cst_21 [2] : vector<4x8x8xf32> to vector<4x8xf32>
    %38 = vector.shape_cast %37 : vector<4x8xf32> to vector<4x8x1xf32>
    %39 = tpu.reciprocal %38 {approx = true} : vector<4x8x1xf32> -> vector<4x8x1xf32>
    %40 = vector.broadcast %39 : vector<4x8x1xf32> to vector<4x8x8xf32>
    %41 = arith.mulf %36, %40 : vector<4x8x8xf32>
    "tpu.trace_start"() <{level = 10 : i32, message = "hqk,hkd->hqd"}> : () -> ()
    %cst_22 = arith.constant dense<0.000000e+00> : vector<4x8x8xf32>
    %42 = tpu.matmul %41, %28, %cst_22 {dimension_numbers = #tpu.dot_dimension_numbers<[2], [1], [1], [2], [0, 0, 0, 1, 1, 2], [0], [0]>} : vector<4x8x8xf32>, vector<4x8x8xf32>, vector<4x8x8xf32> -> vector<4x8x8xf32>
    "tpu.trace_stop"() : () -> ()
    %c0_23 = arith.constant 0 : index
    %c0_24 = arith.constant 0 : index
    %c0_25 = arith.constant 0 : index
    %c0_26 = arith.constant 0 : index
    %43 = vector.load %arg5[%c0_23, %c0_24, %c0_25, %c0_26] : memref<2x4x8x32xf32, #tpu.memory_space<vmem>>, vector<1x4x8x32xf32>
    %44 = vector.shape_cast %43 : vector<1x4x8x32xf32> to vector<4x8x32xf32>
    "tpu.trace_start"() <{level = 10 : i32, message = "hqd,hde->hqe"}> : () -> ()
    %cst_27 = arith.constant dense<0.000000e+00> : vector<4x8x32xf32>
    %45 = tpu.matmul %42, %44, %cst_27 {dimension_numbers = #tpu.dot_dimension_numbers<[2], [1], [1], [2], [0, 0, 0, 1, 1, 2], [0], [0]>} : vector<4x8x8xf32>, vector<4x8x32xf32>, vector<4x8x32xf32> -> vector<4x8x32xf32>
    "tpu.trace_stop"() : () -> ()
    %cst_28 = arith.constant dense<0.000000e+00> : vector<8x32xf32>
    %46 = vector.multi_reduction <add>, %45, %cst_28 [0] : vector<4x8x32xf32> to vector<8x32xf32>
    %47 = vector.broadcast %10 : vector<1x32xf32> to vector<8x32xf32>
    %48 = arith.addf %46, %47 : vector<8x32xf32>
    %49 = arith.addf %7, %48 : vector<8x32xf32>
    %cst_29 = arith.constant dense<0.000000e+00> : vector<8xf32>
    %50 = vector.multi_reduction <add>, %49, %cst_29 [1] : vector<8x32xf32> to vector<8xf32>
    %51 = vector.shape_cast %50 : vector<8xf32> to vector<8x1xf32>
    %cst_30 = arith.constant 3.200000e+01 : f32
    %52 = vector.broadcast %cst_30 : f32 to vector<8x1xf32>
    %53 = arith.divf %51, %52 : vector<8x1xf32>
    %54 = vector.broadcast %53 : vector<8x1xf32> to vector<8x32xf32>
    %55 = arith.subf %49, %54 : vector<8x32xf32>
    %56 = arith.mulf %55, %55 : vector<8x32xf32>
    %cst_31 = arith.constant dense<0.000000e+00> : vector<8xf32>
    %57 = vector.multi_reduction <add>, %56, %cst_31 [1] : vector<8x32xf32> to vector<8xf32>
    %58 = vector.shape_cast %57 : vector<8xf32> to vector<8x1xf32>
    %cst_32 = arith.constant 3.200000e+01 : f32
    %59 = vector.broadcast %cst_32 : f32 to vector<8x1xf32>
    %60 = arith.divf %58, %59 : vector<8x1xf32>
    %cst_33 = arith.constant 9.99999974E-6 : f32
    %61 = vector.broadcast %cst_33 : f32 to vector<8x1xf32>
    %62 = arith.addf %60, %61 : vector<8x1xf32>
    %63 = math.rsqrt %62 : vector<8x1xf32>
    %64 = vector.broadcast %63 : vector<8x1xf32> to vector<8x32xf32>
    %65 = arith.mulf %55, %64 : vector<8x32xf32>
    %66 = vector.broadcast %11 : vector<1x32xf32> to vector<8x32xf32>
    %67 = arith.mulf %65, %66 : vector<8x32xf32>
    %68 = vector.broadcast %12 : vector<1x32xf32> to vector<8x32xf32>
    %69 = arith.addf %67, %68 : vector<8x32xf32>
    %c0_34 = arith.constant 0 : index
    %c0_35 = arith.constant 0 : index
    %c0_36 = arith.constant 0 : index
    %70 = vector.load %arg6[%c0_34, %c0_35, %c0_36] : memref<2x32x128xf32, #tpu.memory_space<vmem>>, vector<1x32x128xf32>
    %71 = vector.shape_cast %70 : vector<1x32x128xf32> to vector<32x128xf32>
    %cst_37 = arith.constant dense<0.000000e+00> : vector<8x128xf32>
    %72 = tpu.matmul %69, %71, %cst_37 {dimension_numbers = #tpu.dot_dimension_numbers<[1], [0], [0], [1], [0, 0, 1, 1], [], []>} : vector<8x32xf32>, vector<32x128xf32>, vector<8x128xf32> -> vector<8x128xf32>
    %c0_38 = arith.constant 0 : index
    %c0_39 = arith.constant 0 : index
    %c0_40 = arith.constant 0 : index
    %73 = vector.load %arg7[%c0_38, %c0_39, %c0_40] : memref<2x1x128xf32, #tpu.memory_space<vmem>>, vector<1x1x128xf32>
    %74 = vector.shape_cast %73 : vector<1x1x128xf32> to vector<1x128xf32>
    %75 = vector.broadcast %74 : vector<1x128xf32> to vector<8x128xf32>
    %76 = arith.addf %72, %75 : vector<8x128xf32>
    %cst_41 = arith.constant 0.000000e+00 : f32
    %77 = vector.broadcast %cst_41 : f32 to vector<8x128xf32>
    %78 = arith.maximumf %76, %77 : vector<8x128xf32>
    %c0_42 = arith.constant 0 : index
    %c0_43 = arith.constant 0 : index
    %c0_44 = arith.constant 0 : index
    %79 = vector.load %arg8[%c0_42, %c0_43, %c0_44] : memref<2x128x32xf32, #tpu.memory_space<vmem>>, vector<1x128x32xf32>
    %80 = vector.shape_cast %79 : vector<1x128x32xf32> to vector<128x32xf32>
    %cst_45 = arith.constant dense<0.000000e+00> : vector<8x32xf32>
    %81 = tpu.matmul %78, %80, %cst_45 {dimension_numbers = #tpu.dot_dimension_numbers<[1], [0], [0], [1], [0, 0, 1, 1], [], []>} : vector<8x128xf32>, vector<128x32xf32>, vector<8x32xf32> -> vector<8x32xf32>
    %82 = vector.broadcast %13 : vector<1x32xf32> to vector<8x32xf32>
    %83 = arith.addf %81, %82 : vector<8x32xf32>
    %84 = arith.addf %69, %83 : vector<8x32xf32>
    %cst_46 = arith.constant dense<0.000000e+00> : vector<8xf32>
    %85 = vector.multi_reduction <add>, %84, %cst_46 [1] : vector<8x32xf32> to vector<8xf32>
    %86 = vector.shape_cast %85 : vector<8xf32> to vector<8x1xf32>
    %cst_47 = arith.constant 3.200000e+01 : f32
    %87 = vector.broadcast %cst_47 : f32 to vector<8x1xf32>
    %88 = arith.divf %86, %87 : vector<8x1xf32>
    %89 = vector.broadcast %88 : vector<8x1xf32> to vector<8x32xf32>
    %90 = arith.subf %84, %89 : vector<8x32xf32>
    %91 = arith.mulf %90, %90 : vector<8x32xf32>
    %cst_48 = arith.constant dense<0.000000e+00> : vector<8xf32>
    %92 = vector.multi_reduction <add>, %91, %cst_48 [1] : vector<8x32xf32> to vector<8xf32>
    %93 = vector.shape_cast %92 : vector<8xf32> to vector<8x1xf32>
    %cst_49 = arith.constant 3.200000e+01 : f32
    %94 = vector.broadcast %cst_49 : f32 to vector<8x1xf32>
    %95 = arith.divf %93, %94 : vector<8x1xf32>
    %cst_50 = arith.constant 9.99999974E-6 : f32
    %96 = vector.broadcast %cst_50 : f32 to vector<8x1xf32>
    %97 = arith.addf %95, %96 : vector<8x1xf32>
    %98 = math.rsqrt %97 : vector<8x1xf32>
    %99 = vector.broadcast %98 : vector<8x1xf32> to vector<8x32xf32>
    %100 = arith.mulf %90, %99 : vector<8x32xf32>
    %101 = vector.broadcast %14 : vector<1x32xf32> to vector<8x32xf32>
    %102 = arith.mulf %100, %101 : vector<8x32xf32>
    %103 = vector.broadcast %15 : vector<1x32xf32> to vector<8x32xf32>
    %104 = arith.addf %102, %103 : vector<8x32xf32>
    %c1 = arith.constant 1 : index
    %c0_51 = arith.constant 0 : index
    %c0_52 = arith.constant 0 : index
    %105 = vector.load %arg9[%c1, %c0_51, %c0_52] : memref<2x6x32xf32, #tpu.memory_space<vmem>>, vector<1x6x32xf32>
    %106 = vector.shape_cast %105 : vector<1x6x32xf32> to vector<6x32xf32>
    %107 = vector.extract_strided_slice %106 {offsets = [0, 0], sizes = [1, 32], strides = [1, 1]} : vector<6x32xf32> to vector<1x32xf32>
    %108 = vector.extract_strided_slice %106 {offsets = [1, 0], sizes = [1, 32], strides = [1, 1]} : vector<6x32xf32> to vector<1x32xf32>
    %109 = vector.extract_strided_slice %106 {offsets = [2, 0], sizes = [1, 32], strides = [1, 1]} : vector<6x32xf32> to vector<1x32xf32>
    %110 = vector.extract_strided_slice %106 {offsets = [3, 0], sizes = [1, 32], strides = [1, 1]} : vector<6x32xf32> to vector<1x32xf32>
    %111 = vector.extract_strided_slice %106 {offsets = [4, 0], sizes = [1, 32], strides = [1, 1]} : vector<6x32xf32> to vector<1x32xf32>
    %112 = vector.extract_strided_slice %106 {offsets = [5, 0], sizes = [1, 32], strides = [1, 1]} : vector<6x32xf32> to vector<1x32xf32>
    %113 = vector.shape_cast %104 : vector<8x32xf32> to vector<1x8x32xf32>
    %114 = vector.shape_cast %113 : vector<1x8x32xf32> to vector<1x8x32xf32>
    %115 = vector.broadcast %114 : vector<1x8x32xf32> to vector<12x8x32xf32>
    %c1_53 = arith.constant 1 : index
    %c0_54 = arith.constant 0 : index
    %c0_55 = arith.constant 0 : index
    %c0_56 = arith.constant 0 : index
    %116 = vector.load %arg3[%c1_53, %c0_54, %c0_55, %c0_56] : memref<2x12x32x8xf32, #tpu.memory_space<vmem>>, vector<1x12x32x8xf32>
    %117 = vector.shape_cast %116 : vector<1x12x32x8xf32> to vector<12x32x8xf32>
    "tpu.trace_start"() <{level = 10 : i32, message = "bse,bef->bsf"}> : () -> ()
    %cst_57 = arith.constant dense<0.000000e+00> : vector<12x8x8xf32>
    %118 = tpu.matmul %115, %117, %cst_57 {dimension_numbers = #tpu.dot_dimension_numbers<[2], [1], [1], [2], [0, 0, 0, 1, 1, 2], [0], [0]>} : vector<12x8x32xf32>, vector<12x32x8xf32>, vector<12x8x8xf32> -> vector<12x8x8xf32>
    "tpu.trace_stop"() : () -> ()
    %c1_58 = arith.constant 1 : index
    %c0_59 = arith.constant 0 : index
    %c0_60 = arith.constant 0 : index
    %c0_61 = arith.constant 0 : index
    %119 = vector.load %arg4[%c1_58, %c0_59, %c0_60, %c0_61] : memref<2x12x1x8xf32, #tpu.memory_space<vmem>>, vector<1x12x1x8xf32>
    %120 = vector.shape_cast %119 : vector<1x12x1x8xf32> to vector<12x1x8xf32>
    %121 = vector.broadcast %120 : vector<12x1x8xf32> to vector<12x8x8xf32>
    %122 = arith.addf %118, %121 : vector<12x8x8xf32>
    %123 = vector.extract_strided_slice %122 {offsets = [0, 0, 0], sizes = [4, 8, 8], strides = [1, 1, 1]} : vector<12x8x8xf32> to vector<4x8x8xf32>
    %124 = vector.extract_strided_slice %122 {offsets = [4, 0, 0], sizes = [4, 8, 8], strides = [1, 1, 1]} : vector<12x8x8xf32> to vector<4x8x8xf32>
    %125 = vector.extract_strided_slice %122 {offsets = [8, 0, 0], sizes = [4, 8, 8], strides = [1, 1, 1]} : vector<12x8x8xf32> to vector<4x8x8xf32>
    "tpu.trace_start"() <{level = 10 : i32, message = "hqd,hkd->hqk"}> : () -> ()
    %cst_62 = arith.constant dense<0.000000e+00> : vector<4x8x8xf32>
    %126 = tpu.matmul %123, %124, %cst_62 {dimension_numbers = #tpu.dot_dimension_numbers<[2], [2], [1], [1], [0, 0, 0, 1, 1, 1], [0], [0]>} : vector<4x8x8xf32>, vector<4x8x8xf32>, vector<4x8x8xf32> -> vector<4x8x8xf32>
    "tpu.trace_stop"() : () -> ()
    %cst_63 = arith.constant 0.353553385 : f32
    %127 = vector.broadcast %cst_63 : f32 to vector<4x8x8xf32>
    %128 = arith.mulf %126, %127 : vector<4x8x8xf32>
    %cst_64 = arith.constant dense<0xFF800000> : vector<4x8xf32>
    %129 = vector.multi_reduction <maximumf>, %128, %cst_64 [2] : vector<4x8x8xf32> to vector<4x8xf32>
    %130 = vector.shape_cast %129 : vector<4x8xf32> to vector<4x8x1xf32>
    %131 = vector.broadcast %130 : vector<4x8x1xf32> to vector<4x8x8xf32>
    %132 = arith.subf %128, %131 : vector<4x8x8xf32>
    %133 = math.exp %132 : vector<4x8x8xf32>
    %cst_65 = arith.constant dense<0.000000e+00> : vector<4x8xf32>
    %134 = vector.multi_reduction <add>, %133, %cst_65 [2] : vector<4x8x8xf32> to vector<4x8xf32>
    %135 = vector.shape_cast %134 : vector<4x8xf32> to vector<4x8x1xf32>
    %136 = tpu.reciprocal %135 {approx = true} : vector<4x8x1xf32> -> vector<4x8x1xf32>
    %137 = vector.broadcast %136 : vector<4x8x1xf32> to vector<4x8x8xf32>
    %138 = arith.mulf %133, %137 : vector<4x8x8xf32>
    "tpu.trace_start"() <{level = 10 : i32, message = "hqk,hkd->hqd"}> : () -> ()
    %cst_66 = arith.constant dense<0.000000e+00> : vector<4x8x8xf32>
    %139 = tpu.matmul %138, %125, %cst_66 {dimension_numbers = #tpu.dot_dimension_numbers<[2], [1], [1], [2], [0, 0, 0, 1, 1, 2], [0], [0]>} : vector<4x8x8xf32>, vector<4x8x8xf32>, vector<4x8x8xf32> -> vector<4x8x8xf32>
    "tpu.trace_stop"() : () -> ()
    %c1_67 = arith.constant 1 : index
    %c0_68 = arith.constant 0 : index
    %c0_69 = arith.constant 0 : index
    %c0_70 = arith.constant 0 : index
    %140 = vector.load %arg5[%c1_67, %c0_68, %c0_69, %c0_70] : memref<2x4x8x32xf32, #tpu.memory_space<vmem>>, vector<1x4x8x32xf32>
    %141 = vector.shape_cast %140 : vector<1x4x8x32xf32> to vector<4x8x32xf32>
    "tpu.trace_start"() <{level = 10 : i32, message = "hqd,hde->hqe"}> : () -> ()
    %cst_71 = arith.constant dense<0.000000e+00> : vector<4x8x32xf32>
    %142 = tpu.matmul %139, %141, %cst_71 {dimension_numbers = #tpu.dot_dimension_numbers<[2], [1], [1], [2], [0, 0, 0, 1, 1, 2], [0], [0]>} : vector<4x8x8xf32>, vector<4x8x32xf32>, vector<4x8x32xf32> -> vector<4x8x32xf32>
    "tpu.trace_stop"() : () -> ()
    %cst_72 = arith.constant dense<0.000000e+00> : vector<8x32xf32>
    %143 = vector.multi_reduction <add>, %142, %cst_72 [0] : vector<4x8x32xf32> to vector<8x32xf32>
    %144 = vector.broadcast %107 : vector<1x32xf32> to vector<8x32xf32>
    %145 = arith.addf %143, %144 : vector<8x32xf32>
    %146 = arith.addf %104, %145 : vector<8x32xf32>
    %cst_73 = arith.constant dense<0.000000e+00> : vector<8xf32>
    %147 = vector.multi_reduction <add>, %146, %cst_73 [1] : vector<8x32xf32> to vector<8xf32>
    %148 = vector.shape_cast %147 : vector<8xf32> to vector<8x1xf32>
    %cst_74 = arith.constant 3.200000e+01 : f32
    %149 = vector.broadcast %cst_74 : f32 to vector<8x1xf32>
    %150 = arith.divf %148, %149 : vector<8x1xf32>
    %151 = vector.broadcast %150 : vector<8x1xf32> to vector<8x32xf32>
    %152 = arith.subf %146, %151 : vector<8x32xf32>
    %153 = arith.mulf %152, %152 : vector<8x32xf32>
    %cst_75 = arith.constant dense<0.000000e+00> : vector<8xf32>
    %154 = vector.multi_reduction <add>, %153, %cst_75 [1] : vector<8x32xf32> to vector<8xf32>
    %155 = vector.shape_cast %154 : vector<8xf32> to vector<8x1xf32>
    %cst_76 = arith.constant 3.200000e+01 : f32
    %156 = vector.broadcast %cst_76 : f32 to vector<8x1xf32>
    %157 = arith.divf %155, %156 : vector<8x1xf32>
    %cst_77 = arith.constant 9.99999974E-6 : f32
    %158 = vector.broadcast %cst_77 : f32 to vector<8x1xf32>
    %159 = arith.addf %157, %158 : vector<8x1xf32>
    %160 = math.rsqrt %159 : vector<8x1xf32>
    %161 = vector.broadcast %160 : vector<8x1xf32> to vector<8x32xf32>
    %162 = arith.mulf %152, %161 : vector<8x32xf32>
    %163 = vector.broadcast %108 : vector<1x32xf32> to vector<8x32xf32>
    %164 = arith.mulf %162, %163 : vector<8x32xf32>
    %165 = vector.broadcast %109 : vector<1x32xf32> to vector<8x32xf32>
    %166 = arith.addf %164, %165 : vector<8x32xf32>
    %c1_78 = arith.constant 1 : index
    %c0_79 = arith.constant 0 : index
    %c0_80 = arith.constant 0 : index
    %167 = vector.load %arg6[%c1_78, %c0_79, %c0_80] : memref<2x32x128xf32, #tpu.memory_space<vmem>>, vector<1x32x128xf32>
    %168 = vector.shape_cast %167 : vector<1x32x128xf32> to vector<32x128xf32>
    %cst_81 = arith.constant dense<0.000000e+00> : vector<8x128xf32>
    %169 = tpu.matmul %166, %168, %cst_81 {dimension_numbers = #tpu.dot_dimension_numbers<[1], [0], [0], [1], [0, 0, 1, 1], [], []>} : vector<8x32xf32>, vector<32x128xf32>, vector<8x128xf32> -> vector<8x128xf32>
    %c1_82 = arith.constant 1 : index
    %c0_83 = arith.constant 0 : index
    %c0_84 = arith.constant 0 : index
    %170 = vector.load %arg7[%c1_82, %c0_83, %c0_84] : memref<2x1x128xf32, #tpu.memory_space<vmem>>, vector<1x1x128xf32>
    %171 = vector.shape_cast %170 : vector<1x1x128xf32> to vector<1x128xf32>
    %172 = vector.broadcast %171 : vector<1x128xf32> to vector<8x128xf32>
    %173 = arith.addf %169, %172 : vector<8x128xf32>
    %cst_85 = arith.constant 0.000000e+00 : f32
    %174 = vector.broadcast %cst_85 : f32 to vector<8x128xf32>
    %175 = arith.maximumf %173, %174 : vector<8x128xf32>
    %c1_86 = arith.constant 1 : index
    %c0_87 = arith.constant 0 : index
    %c0_88 = arith.constant 0 : index
    %176 = vector.load %arg8[%c1_86, %c0_87, %c0_88] : memref<2x128x32xf32, #tpu.memory_space<vmem>>, vector<1x128x32xf32>
    %177 = vector.shape_cast %176 : vector<1x128x32xf32> to vector<128x32xf32>
    %cst_89 = arith.constant dense<0.000000e+00> : vector<8x32xf32>
    %178 = tpu.matmul %175, %177, %cst_89 {dimension_numbers = #tpu.dot_dimension_numbers<[1], [0], [0], [1], [0, 0, 1, 1], [], []>} : vector<8x128xf32>, vector<128x32xf32>, vector<8x32xf32> -> vector<8x32xf32>
    %179 = vector.broadcast %110 : vector<1x32xf32> to vector<8x32xf32>
    %180 = arith.addf %178, %179 : vector<8x32xf32>
    %181 = arith.addf %166, %180 : vector<8x32xf32>
    %cst_90 = arith.constant dense<0.000000e+00> : vector<8xf32>
    %182 = vector.multi_reduction <add>, %181, %cst_90 [1] : vector<8x32xf32> to vector<8xf32>
    %183 = vector.shape_cast %182 : vector<8xf32> to vector<8x1xf32>
    %cst_91 = arith.constant 3.200000e+01 : f32
    %184 = vector.broadcast %cst_91 : f32 to vector<8x1xf32>
    %185 = arith.divf %183, %184 : vector<8x1xf32>
    %186 = vector.broadcast %185 : vector<8x1xf32> to vector<8x32xf32>
    %187 = arith.subf %181, %186 : vector<8x32xf32>
    %188 = arith.mulf %187, %187 : vector<8x32xf32>
    %cst_92 = arith.constant dense<0.000000e+00> : vector<8xf32>
    %189 = vector.multi_reduction <add>, %188, %cst_92 [1] : vector<8x32xf32> to vector<8xf32>
    %190 = vector.shape_cast %189 : vector<8xf32> to vector<8x1xf32>
    %cst_93 = arith.constant 3.200000e+01 : f32
    %191 = vector.broadcast %cst_93 : f32 to vector<8x1xf32>
    %192 = arith.divf %190, %191 : vector<8x1xf32>
    %cst_94 = arith.constant 9.99999974E-6 : f32
    %193 = vector.broadcast %cst_94 : f32 to vector<8x1xf32>
    %194 = arith.addf %192, %193 : vector<8x1xf32>
    %195 = math.rsqrt %194 : vector<8x1xf32>
    %196 = vector.broadcast %195 : vector<8x1xf32> to vector<8x32xf32>
    %197 = arith.mulf %187, %196 : vector<8x32xf32>
    %198 = vector.broadcast %111 : vector<1x32xf32> to vector<8x32xf32>
    %199 = arith.mulf %197, %198 : vector<8x32xf32>
    %200 = vector.broadcast %112 : vector<1x32xf32> to vector<8x32xf32>
    %201 = arith.addf %199, %200 : vector<8x32xf32>
    %c0_95 = arith.constant 0 : index
    %c0_96 = arith.constant 0 : index
    %202 = vector.load %arg10[%c0_95, %c0_96] : memref<32x64xf32, #tpu.memory_space<vmem>>, vector<32x64xf32>
    %cst_97 = arith.constant dense<0.000000e+00> : vector<8x64xf32>
    %203 = tpu.matmul %201, %202, %cst_97 {dimension_numbers = #tpu.dot_dimension_numbers<[1], [0], [0], [1], [0, 0, 1, 1], [], []>} : vector<8x32xf32>, vector<32x64xf32>, vector<8x64xf32> -> vector<8x64xf32>
    %c0_98 = arith.constant 0 : index
    %c0_99 = arith.constant 0 : index
    %204 = vector.load %arg11[%c0_98, %c0_99] : memref<1x64xf32, #tpu.memory_space<vmem>>, vector<1x64xf32>
    %205 = vector.broadcast %204 : vector<1x64xf32> to vector<8x64xf32>
    %206 = arith.addf %203, %205 : vector<8x64xf32>
    %207 = math.tanh %206 : vector<8x64xf32>
    %c0_100 = arith.constant 0 : index
    %c0_101 = arith.constant 0 : index
    %208 = vector.load %arg12[%c0_100, %c0_101] : memref<8x64xf32, #tpu.memory_space<vmem>>, vector<8x64xf32>
    tpu.vector_store %arg12[%c0_100, %c0_101], %207 {strides = array<i32>} : memref<8x64xf32, #tpu.memory_space<vmem>>, vector<8x64xf32>,
    return
  }
}

</mosaic_0001>

<bundles_post_ra>
// kernel: tpu_custom_call.1
= control target key start
LH: loop header
LB: loop body
LE: loop exit
PB: predicated region body
PF: predicated region fallthrough
CT: control target
= control target key end

     0   :  { %v5743_v3 = vmov 0.0|0.0   ;;  %vm5744_vm0 = vmmov 0   ;;  %v5745_v6 = vmov 0.0   ;;  %s6771_s0 = inlined_call_operand.vmem [shape: f32[8,64], index: 0, kind: input, shape index: {}]   ;;  %s6772_s1 = inlined_call_operand.vmem [shape: f32[64,32], index: 1, kind: input, shape index: {}]   ;;  %s6773_s2 = inlined_call_operand.vmem [shape: f32[1,32], index: 2, kind: input, shape index: {}]   ;;  %s6774_s3 = inlined_call_operand.vmem [shape: f32[2,12,32,8], index: 3, kind: input, shape index: {}]   ;;  %s6775_s4 = inlined_call_operand.vmem [shape: f32[2,12,1,8], index: 4, kind: input, shape index: {}]   ;;  %s6776_s5 = inlined_call_operand.vmem [shape: f32[2,4,8,32], index: 5, kind: input, shape index: {}]   ;;  %s6777_s6 = inlined_call_operand.vmem [shape: f32[2,32,128], index: 6, kind: input, shape index: {}]   ;;  %s6778_s7 = inlined_call_operand.vmem [shape: f32[2,1,128], index: 7, kind: input, shape index: {}]   ;;  %s6779_s8 = inlined_call_operand.vmem [shape: f32[2,128,32], index: 8, kind: input, shape index: {}]   ;;  %s6780_s9 = inlined_call_operand.vmem [shape: f32[2,6,32], index: 9, kind: input, shape index: {}]   ;;  %s6781_s10 = inlined_call_operand.vmem [shape: f32[32,64], index: 10, kind: input, shape index: {}]   ;;  %s6782_s11 = inlined_call_operand.vmem [shape: f32[1,64], index: 11, kind: input, shape index: {}]   ;;  %s6783_s12 = inlined_call_operand.hbm [shape: f32[8,64], index: 12, kind: output, shape index: {}]  }
   0x1   :  { %v43_v0 = vld [vmem:[%s6772_s1] sm:$0xff]  ;;  %v44_v1 = vld [vmem:[%s6772_s1 + $0x8] sm:$0xff]  ;;  %v45_v2 = vld [vmem:[%s6772_s1 + $0x10] sm:$0xff]  ;;  %5451 = vmatprep.subr.bf16.mxu0 %v5743_v3  ;;  %4961 = vmatprep.mubr.msk.f32.mxu0 %vm5744_vm0, %v5745_v6 }
   0x2   :  { %v5452_v4 = vpack.c.bf16 %v44_v1, %v43_v0  ;;  %v46_v5 = vld [vmem:[%s6772_s1 + $0x18] sm:$0xff]  ;;  %5469 = vmatprep.subr.bf16.mxu1 %v5743_v3  ;;  %4983 = vmatprep.mubr.msk.f32.mxu1 %vm5744_vm0, %v5745_v6  ;;  %v47_v8 = vld [vmem:[%s6772_s1 + $0x20] sm:$0xff]  ;;  %v48_v10 = vld [vmem:[%s6772_s1 + $0x28] sm:$0xff] }
   0x3   :  { %v5455_v7 = vpack.c.bf16 %v46_v5, %v45_v2  ;;  %v138_v9 = vld [vmem:[%s6774_s3 + $0x20] sm:$0xff]  ;;  %v139_v11 = vld [vmem:[%s6774_s3 + $0x28] sm:$0xff] }
   0x4   :  { %5453 = vmatpush3.bf16.msra.mxu0 %v5452_v4 }
   0x5   :  { %5454 = vmatprep.subr.bf16.mxu0 %v5743_v3 }
   0x6   :  { %17 = vsyncpa [#allocation3], 0  ;;  %v5470_v12 = vpack.c.bf16 %v139_v11, %v138_v9  ;;  %v5458_v13 = vpack.c.bf16 %v48_v10, %v47_v8  ;;  %v49_v14 = vld [vmem:[%s6772_s1 + $0x30] sm:$0xff]  ;;  %v50_v15 = vld [vmem:[%s6772_s1 + $0x38] sm:$0xff]  ;;  %vm58_vm1 = vcmask 523264   ;;  %vm266_vm2 = vcmask 261120  }
   0x7   :  { %v5461_v16 = vpack.c.bf16 %v50_v15, %v49_v14  ;;  %v134_v17 = vld [vmem:[%s6774_s3] sm:$0xff]  ;;  %v135_v18 = vld [vmem:[%s6774_s3 + $0x8] sm:$0xff]  ;;  %v136_v21 = vld [vmem:[%s6774_s3 + $0x10] sm:$0xff]  ;;  %vm1110_vm3 = vcmask 64512   ;;  %s5746_s26 = smov [#allocation2]  }
   0x8   :  { %5456 = vmatpush3.bf16.msra.mxu0 %v5455_v7  ;;  %5471 = vmatpush3.bf16.msra.mxu1 %v5470_v12  ;;  %v42_v19 = vld [vmem:[%s6771_s0] sm:$0xff]  ;;  %v5464_v20 = vpack.c.bf16 %v135_v18, %v134_v17  ;;  %v137_v22 = vld [vmem:[%s6774_s3 + $0x18] sm:$0xff]  ;;  %v140_v23 = vld [vmem:[%s6774_s3 + $0x30] sm:$0xff] }
   0x9   :  { %5457 = vmatprep.subr.bf16.mxu0 %v5743_v3  ;;  %5472 = vmatprep.subr.bf16.mxu1 %v5743_v3  ;;  %v5467_v24 = vpack.c.bf16 %v137_v22, %v136_v21  ;;  %v141_v25 = vld [vmem:[%s6774_s3 + $0x38] sm:$0xff]  ;;  %v4545_v27 = vld [vmem:[%s6773_s2] ss:$0 sm:$0xff]  ;;  %v143_v29 = vld [vmem:[%s6774_s3 + $0x48] sm:$0xff] }
   0xa   :  { %v5473_v26 = vpack.c.bf16 %v141_v25, %v140_v23  ;;  %v142_v28 = vld [vmem:[%s6774_s3 + $0x40] sm:$0xff]  ;;  %v147_v31 = vld [vmem:[%s6774_s3 + $0x68] sm:$0xff]  ;;  %v144_v37 = vld [vmem:[%s6774_s3 + $0x50] sm:$0xff] }
   0xb   :  { %v146_v30 = vld [vmem:[%s6774_s3 + $0x60] sm:$0xff]  ;;  %v5476_v35 = vpack.c.bf16 %v143_v29, %v142_v28  ;;  %v145_v39 = vld [vmem:[%s6774_s3 + $0x58] sm:$0xff]  ;;  %v148_v40 = vld [vmem:[%s6774_s3 + $0x70] sm:$0xff] }
   0xc   :  { %5459 = vmatpush3.bf16.msra.mxu0 %v5458_v13  ;;  %5474 = vmatpush3.bf16.msra.mxu1 %v5473_v26  ;;  %v5482_v36 = vpack.c.bf16 %v147_v31, %v146_v30  ;;  %v149_v41 = vld [vmem:[%s6774_s3 + $0x78] sm:$0xff]  ;;  %v5479_v42 = vpack.c.bf16 %v145_v39, %v144_v37  ;;  %v150_v44 = vld [vmem:[%s6774_s3 + $0x80] sm:$0xff]  ;;  %v151_v45 = vld [vmem:[%s6774_s3 + $0x88] sm:$0xff] }
   0xd   :  { %5460 = vmatprep.subr.bf16.mxu0 %v5743_v3  ;;  %5481 = vmatprep.subr.bf16.mxu1 %v5743_v3  ;;  %v5485_v43 = vpack.c.bf16 %v149_v41, %v148_v40  ;;  %v154_v46 = vld [vmem:[%s6774_s3 + $0xa0] sm:$0xff]  ;;  %v155_v47 = vld [vmem:[%s6774_s3 + $0xa8] sm:$0xff]  ;;  %v5488_v48 = vpack.c.bf16 %v151_v45, %v150_v44  ;;  %v152_v50 = vld [vmem:[%s6774_s3 + $0x90] sm:$0xff] }
   0xe   :  { %v5494_v49 = vpack.c.bf16 %v155_v47, %v154_v46  ;;  %v153_v51 = vld [vmem:[%s6774_s3 + $0x98] sm:$0xff]  ;;  %v156_v52 = vld [vmem:[%s6774_s3 + $0xb0] sm:$0xff]  ;;  %v158_v56 = vld [vmem:[%s6774_s3 + $0xc0] sm:$0xff] }
   0xf   :  { %v157_v53 = vld [vmem:[%s6774_s3 + $0xb8] sm:$0xff]  ;;  %v5491_v54 = vpack.c.bf16 %v153_v51, %v152_v50  ;;  %v159_v57 = vld [vmem:[%s6774_s3 + $0xc8] sm:$0xff]  ;;  %v162_v58 = vld [vmem:[%s6774_s3 + $0xe0] sm:$0xff] }
  0x10   :  { %5462 = vmatpush3.bf16.msra.mxu0 %v5461_v16  ;;  %v5497_v55 = vpack.c.bf16 %v157_v53, %v156_v52  ;;  %v163_v59 = vld [vmem:[%s6774_s3 + $0xe8] sm:$0xff]  ;;  %v5500_v60 = vpack.c.bf16 %v159_v57, %v158_v56  ;;  %v160_v62 = vld [vmem:[%s6774_s3 + $0xd0] sm:$0xff]  ;;  %v161_v63 = vld [vmem:[%s6774_s3 + $0xd8] sm:$0xff] }
  0x11   :  { %5463 = vmatprep.subr.bf16.mxu0 %v5743_v3  ;;  %v5506_v61 = vpack.c.bf16 %v163_v59, %v162_v58  ;;  %v164_v0 = vld [vmem:[%s6774_s3 + $0xf0] sm:$0xff]  ;;  %v165_v1 = vld [vmem:[%s6774_s3 + $0xf8] sm:$0xff]  ;;  %v5503_v2 = vpack.c.bf16 %v161_v63, %v160_v62  ;;  %v166_v5 = vld [vmem:[%s6774_s3 + $0x100] sm:$0xff] }
  0x12   :  { %v5509_v4 = vpack.c.bf16 %v165_v1, %v164_v0  ;;  %v167_v7 = vld [vmem:[%s6774_s3 + $0x108] sm:$0xff]  ;;  %v170_v8 = vld [vmem:[%s6774_s3 + $0x120] sm:$0xff]  ;;  %v168_v12 = vld [vmem:[%s6774_s3 + $0x110] sm:$0xff] }
  0x13   :  { %4962 = vmatmul.mubr.msk.f32.vlgmr.msra.gmra.mrb[0].mxu0 %vm58_vm1, %v42_v19  ;;  %v171_v9 = vld [vmem:[%s6774_s3 + $0x128] sm:$0xff]  ;;  %v5512_v10 = vpack.c.bf16 %v167_v7, %v166_v5  ;;  %v169_v13 = vld [vmem:[%s6774_s3 + $0x118] sm:$0xff]  ;;  %v172_v14 = vld [vmem:[%s6774_s3 + $0x130] sm:$0xff] }
  0x14   :  { %5465 = vmatpush3.bf16.msra.mxu0 %v5464_v20  ;;  %4972 = vmatprep.mubr.msk.f32.mxu0 %vm5744_vm0, %v5745_v6  ;;  %v5518_v11 = vpack.c.bf16 %v171_v9, %v170_v8  ;;  %v173_v15 = vld [vmem:[%s6774_s3 + $0x138] sm:$0xff]  ;;  %v5515_v16 = vpack.c.bf16 %v169_v13, %v168_v12  ;;  %v174_v18 = vld [vmem:[%s6774_s3 + $0x140] sm:$0xff]  ;;  %v175_v19 = vld [vmem:[%s6774_s3 + $0x148] sm:$0xff] }
  0x15   :  { %5466 = vmatprep.subr.bf16.mxu0 %v5743_v3  ;;  %v5521_v17 = vpack.c.bf16 %v173_v15, %v172_v14  ;;  %v178_v20 = vld [vmem:[%s6774_s3 + $0x160] sm:$0xff]  ;;  %v179_v21 = vld [vmem:[%s6774_s3 + $0x168] sm:$0xff]  ;;  %v5524_v22 = vpack.c.bf16 %v175_v19, %v174_v18  ;;  %v177_v25 = vld [vmem:[%s6774_s3 + $0x158] sm:$0xff] }
  0x16   :  { %v5530_v23 = vpack.c.bf16 %v179_v21, %v178_v20  ;;  %v180_v26 = vld [vmem:[%s6774_s3 + $0x170] sm:$0xff]  ;;  %v4551_v39 = vld [vmem:[%s6775_s4 + $0x4] ss:$0 sm:$0xff]  ;;  %v4552_v40 = vld [vmem:[%s6775_s4 + $0x5] ss:$0 sm:$0xff] }
  0x17   :  { %v4548_v44 = vld [vmem:[%s6775_s4 + $0x1] ss:$0 sm:$0xff]  ;;  %v4553_v51 = vld [vmem:[%s6775_s4 + $0x6] ss:$0 sm:$0xff]  ;;  %v4554_v52 = vld [vmem:[%s6775_s4 + $0x7] ss:$0 sm:$0xff] }
  0x18   :  { %5468 = vmatpush3.bf16.msra.mxu0 %v5467_v24  ;;  %v176_v24 = vld [vmem:[%s6774_s3 + $0x150] sm:$0xff]  ;;  %v4550_v56 = vld [vmem:[%s6775_s4 + $0x3] ss:$0 sm:$0xff]  ;;  %v4555_v63 = vld [vmem:[%s6775_s4 + $0x8] ss:$0 sm:$0xff] }
  0x19   :  { %5475 = vmatprep.subr.bf16.mxu0 %v5743_v3  ;;  %v5527_v28 = vpack.c.bf16 %v177_v25, %v176_v24  ;;  %v4556_v0 = vld [vmem:[%s6775_s4 + $0x9] ss:$0 sm:$0xff] }
  0xe6   :  { %v128_v32 = vpop.f32.mrb[0].mxu0 }
  0xe7   :  { %v129_v33 = vadd.f32 %v4545_v27, %v128_v32  ;;  %v4963_v34 = vpop.f32.mrb[1].mxu0  ;;  %v181_v27 = vld [vmem:[%s6774_s3 + $0x178] sm:$0xff] }
  0xe8   :  { %v5533_v29 = vpack.c.bf16 %v181_v27, %v180_v26 }
  0xe9   :  { %v5898_v38 = vmax.f32 %v129_v33, 0.0 }
  0xeb   :  { %4973 = vmatmul.mubr.msk.f32.vlgmr.msra.gmra.mrb[2].mxu0 %vm266_vm2, %v5898_v38  ;;  %4984 = vmatmul.mubr.msk.f32.vlgmr.msra.gmra.mrb[0].mxu1 %vm266_vm2, %v5898_v38 }
  0xec   :  { %5477 = vmatpush3.bf16.msra.mxu0 %v5476_v35  ;;  %5483 = vmatpush3.bf16.msra.mxu1 %v5482_v36 }
  0xed   :  { %5478 = vmatprep.subr.bf16.mxu0 %v5743_v3  ;;  %5484 = vmatprep.subr.bf16.mxu1 %v5743_v3 }
  0xee   :  { %4994 = vmatprep.mubr.msk.f32.mxu0 %vm5744_vm0, %v5745_v6  ;;  %5005 = vmatprep.mubr.msk.f32.mxu1 %vm5744_vm0, %v5745_v6 }
  0xf0   :  { %5480 = vmatpush3.bf16.msra.mxu0 %v5479_v42  ;;  %5486 = vmatpush3.bf16.msra.mxu1 %v5485_v43  ;;  %v4547_v43 = vld [vmem:[%s6775_s4] ss:$0 sm:$0xff] }
  0xf1   :  { %5487 = vmatprep.subr.bf16.mxu0 %v5743_v3  ;;  %5493 = vmatprep.subr.bf16.mxu1 %v5743_v3 }
  0xf3   :  { %4995 = vmatmul.mubr.msk.f32.vlgmr.msra.gmra.mrb[4].mxu0 %vm266_vm2, %v5898_v38  ;;  %5006 = vmatmul.mubr.msk.f32.vlgmr.msra.gmra.mrb[2].mxu1 %vm266_vm2, %v5898_v38 }
  0xf4   :  { %5489 = vmatpush3.bf16.msra.mxu0 %v5488_v48  ;;  %5495 = vmatpush3.bf16.msra.mxu1 %v5494_v49 }
  0xf5   :  { %5490 = vmatprep.subr.bf16.mxu0 %v5743_v3  ;;  %5496 = vmatprep.subr.bf16.mxu1 %v5743_v3 }
  0xf6   :  { %5016 = vmatprep.mubr.msk.f32.mxu0 %vm5744_vm0, %v5745_v6  ;;  %5027 = vmatprep.mubr.msk.f32.mxu1 %vm5744_vm0, %v5745_v6 }
  0xf8   :  { %5492 = vmatpush3.bf16.msra.mxu0 %v5491_v54  ;;  %5498 = vmatpush3.bf16.msra.mxu1 %v5497_v55  ;;  %v4549_v55 = vld [vmem:[%s6775_s4 + $0x2] ss:$0 sm:$0xff] }
  0xf9   :  { %5499 = vmatprep.subr.bf16.mxu0 %v5743_v3  ;;  %5505 = vmatprep.subr.bf16.mxu1 %v5743_v3 }
  0xfb   :  { %5017 = vmatmul.mubr.msk.f32.vlgmr.msra.gmra.mrb[6].mxu0 %vm266_vm2, %v5898_v38  ;;  %5028 = vmatmul.mubr.msk.f32.vlgmr.msra.gmra.mrb[4].mxu1 %vm266_vm2, %v5898_v38 }
  0xfc   :  { %5501 = vmatpush3.bf16.msra.mxu0 %v5500_v60  ;;  %5507 = vmatpush3.bf16.msra.mxu1 %v5506_v61 }
  0xfd   :  { %5502 = vmatprep.subr.bf16.mxu0 %v5743_v3  ;;  %5508 = vmatprep.subr.bf16.mxu1 %v5743_v3 }
  0xfe   :  { %5038 = vmatprep.mubr.msk.f32.mxu0 %vm5744_vm0, %v5745_v6  ;;  %5049 = vmatprep.mubr.msk.f32.mxu1 %vm5744_vm0, %v5745_v6 }
 0x100   :  { %5504 = vmatpush3.bf16.msra.mxu0 %v5503_v2  ;;  %5510 = vmatpush3.bf16.msra.mxu1 %v5509_v4 }
 0x101   :  { %5511 = vmatprep.subr.bf16.mxu0 %v5743_v3  ;;  %5517 = vmatprep.subr.bf16.mxu1 %v5743_v3 }
 0x103   :  { %5039 = vmatmul.mubr.msk.f32.vlgmr.msra.gmra.mrb[8].mxu0 %vm266_vm2, %v5898_v38  ;;  %5050 = vmatmul.mubr.msk.f32.vlgmr.msra.gmra.mrb[6].mxu1 %vm266_vm2, %v5898_v38 }
 0x104   :  { %5513 = vmatpush3.bf16.msra.mxu0 %v5512_v10  ;;  %5519 = vmatpush3.bf16.msra.mxu1 %v5518_v11 }
 0x105   :  { %5514 = vmatprep.subr.bf16.mxu0 %v5743_v3  ;;  %5520 = vmatprep.subr.bf16.mxu1 %v5743_v3 }
 0x106   :  { %5060 = vmatprep.mubr.msk.f32.mxu0 %vm5744_vm0, %v5745_v6  ;;  %5071 = vmatprep.mubr.msk.f32.mxu1 %vm5744_vm0, %v5745_v6 }
 0x108   :  { %5516 = vmatpush3.bf16.msra.mxu0 %v5515_v16  ;;  %5522 = vmatpush3.bf16.msra.mxu1 %v5521_v17 }
 0x109   :  { %5523 = vmatprep.subr.bf16.mxu0 %v5743_v3  ;;  %5529 = vmatprep.subr.bf16.mxu1 %v5743_v3 }
 0x10b   :  { %5061 = vmatmul.mubr.msk.f32.vlgmr.msra.gmra.mrb[10].mxu0 %vm266_vm2, %v5898_v38  ;;  %5072 = vmatmul.mubr.msk.f32.vlgmr.msra.gmra.mrb[8].mxu1 %vm266_vm2, %v5898_v38 }
 0x10c   :  { %5525 = vmatpush3.bf16.msra.mxu0 %v5524_v22  ;;  %5531 = vmatpush3.bf16.msra.mxu1 %v5530_v23 }
 0x10d   :  { %5526 = vmatprep.subr.bf16.mxu0 %v5743_v3  ;;  %5532 = vmatprep.subr.bf16.mxu1 %v5743_v3 }
 0x10e   :  { %5082 = vmatprep.mubr.msk.f32.mxu0 %vm5744_vm0, %v5745_v6  ;;  %5093 = vmatprep.mubr.msk.f32.mxu1 %vm5744_vm0, %v5745_v6 }
 0x110   :  { %5528 = vmatpush3.bf16.msra.mxu0 %v5527_v28  ;;  %5534 = vmatpush3.bf16.msra.mxu1 %v5533_v29 }
 0x111   :  { %5096 = vmatprep.subr.mxu0 %v5745_v6  ;;  %5101 = vmatprep.subr.mxu1 %v5745_v6 }
 0x113   :  { %5083 = vmatmul.mubr.msk.f32.vlgmr.msra.gmra.mrb[12].mxu0 %vm266_vm2, %v5898_v38  ;;  %5094 = vmatmul.mubr.msk.f32.vlgmr.msra.gmra.mrb[10].mxu1 %vm266_vm2, %v5898_v38 }
 0x114   :  { %5098 = vmatprep.mubr.msk.f32.mxu0 %vm5744_vm0, %v5745_v6  ;;  %5103 = vmatprep.mubr.msk.f32.mxu1 %vm5744_vm0, %v5745_v6 }
 0x1be   :  { %v336_v30 = vpop.f32.mrb[2].mxu0  ;;  %v406_v31 = vpop.f32.mrb[0].mxu1 }
 0x1bf   :  { %v4974_v32 = vpop.f32.mrb[3].mxu0  ;;  %v4985_v33 = vpop.f32.mrb[1].mxu1  ;;  %v337_v49 = vadd.f32 %v4547_v43, %v336_v30  ;;  %v407_v50 = vadd.f32 %v4548_v44, %v406_v31 }
 0x1c6   :  { %v476_v34 = vpop.f32.mrb[4].mxu0  ;;  %v546_v35 = vpop.f32.mrb[2].mxu1 }
 0x1c7   :  { %v4996_v36 = vpop.f32.mrb[5].mxu0  ;;  %v5007_v37 = vpop.f32.mrb[3].mxu1  ;;  %v477_v61 = vadd.f32 %v4549_v55, %v476_v34  ;;  %v547_v62 = vadd.f32 %v4550_v56, %v546_v35 }
 0x1ce   :  { %v616_v41 = vpop.f32.mrb[6].mxu0  ;;  %v686_v42 = vpop.f32.mrb[4].mxu1 }
 0x1cf   :  { %v617_v45 = vadd.f32 %v4551_v39, %v616_v41  ;;  %v687_v46 = vadd.f32 %v4552_v40, %v686_v42  ;;  %v5018_v47 = vpop.f32.mrb[7].mxu0  ;;  %v5029_v48 = vpop.f32.mrb[5].mxu1 }
 0x1d1   :  { %5097 = vmatpush3.xpose.msk.msra.mxu0 %vm1110_vm3, %v617_v45  ;;  %5102 = vmatpush3.xpose.msk.msra.mxu1 %vm1110_vm3, %v687_v46 }
 0x1d2   :  { %5106 = vmatprep.subr.mxu0 %v5745_v6  ;;  %5111 = vmatprep.subr.mxu1 %v5745_v6 }
 0x1d4   :  { %5099 = vmatmul.mubr.msk.f32.vlgmr.msra.gmra.mrb[14].mxu0 %vm1110_vm3, %v337_v49  ;;  %5104 = vmatmul.mubr.msk.f32.vlgmr.msra.gmra.mrb[12].mxu1 %vm1110_vm3, %v407_v50 }
 0x1d5   :  { %5108 = vmatprep.mubr.msk.f32.mxu0 %vm5744_vm0, %v5745_v6  ;;  %5113 = vmatprep.mubr.msk.f32.mxu1 %vm5744_vm0, %v5745_v6 }
 0x1d6   :  { %v756_v53 = vpop.f32.mrb[8].mxu0  ;;  %v826_v54 = vpop.f32.mrb[6].mxu1 }
 0x1d7   :  { %v757_v57 = vadd.f32 %v4553_v51, %v756_v53  ;;  %v827_v58 = vadd.f32 %v4554_v52, %v826_v54  ;;  %v5040_v59 = vpop.f32.mrb[9].mxu0  ;;  %v5051_v60 = vpop.f32.mrb[7].mxu1  ;;  %v4557_v53 = vld [vmem:[%s6775_s4 + $0xa] ss:$0 sm:$0xff] }
 0x1d9   :  { %5107 = vmatpush3.xpose.msk.msra.mxu0 %vm1110_vm3, %v757_v57  ;;  %5112 = vmatpush3.xpose.msk.msra.mxu1 %vm1110_vm3, %v827_v58  ;;  %v4558_v58 = vld [vmem:[%s6775_s4 + $0xb] ss:$0 sm:$0xff] }
 0x1da   :  { %5116 = vmatprep.subr.mxu0 %v5745_v6  ;;  %5121 = vmatprep.subr.mxu1 %v5745_v6 }
 0x1dc   :  { %5109 = vmatmul.mubr.msk.f32.vlgmr.msra.gmra.mrb[16].mxu0 %vm1110_vm3, %v477_v61  ;;  %5114 = vmatmul.mubr.msk.f32.vlgmr.msra.gmra.mrb[14].mxu1 %vm1110_vm3, %v547_v62 }
 0x1dd   :  { %5118 = vmatprep.mubr.msk.f32.mxu0 %vm5744_vm0, %v5745_v6  ;;  %5123 = vmatprep.mubr.msk.f32.mxu1 %vm5744_vm0, %v5745_v6 }
 0x1de   :  { %v896_v1 = vpop.f32.mrb[10].mxu0  ;;  %v966_v2 = vpop.f32.mrb[8].mxu1 }
 0x1df   :  { %v897_v4 = vadd.f32 %v4555_v63, %v896_v1  ;;  %v967_v5 = vadd.f32 %v4556_v0, %v966_v2  ;;  %v5062_v7 = vpop.f32.mrb[11].mxu0  ;;  %v5073_v8 = vpop.f32.mrb[9].mxu1  ;;  %v1755_v2 = vld [vmem:[%s6776_s5] sm:$0xff] }
 0x1e1   :  { %5117 = vmatpush3.msra.mxu0 %v897_v4  ;;  %5122 = vmatpush3.msra.mxu1 %v967_v5  ;;  %v1756_v4 = vld [vmem:[%s6776_s5 + $0x8] sm:$0xff]  ;;  %v1757_v5 = vld [vmem:[%s6776_s5 + $0x10] sm:$0xff] }
 0x1e2   :  { %5126 = vmatprep.subr.mxu0 %v5745_v6  ;;  %5131 = vmatprep.subr.mxu1 %v5745_v6 }
 0x1e6   :  { %v1036_v9 = vpop.f32.mrb[12].mxu0  ;;  %v6125_v10 = vpop.f32.mrb[10].mxu1 }
 0x1e7   :  { %v5084_v11 = vpop.f32.mrb[13].mxu0  ;;  %v5095_v12 = vpop.f32.mrb[11].mxu1  ;;  %v1037_v57 = vadd.f32 %v4557_v53, %v1036_v9  ;;  %v1107_v61 = vadd.f32 %v4558_v58, %v6125_v10  ;;  %v1758_v9 = vld [vmem:[%s6776_s5 + $0x18] sm:$0xff] }
 0x2a7   :  { %v1183_v13 = vpop.f32.mrb[14].mxu0  ;;  %v1259_v14 = vpop.f32.mrb[12].mxu1 }
 0x2a8   :  { %v1415_v15 = vmul.f32 0.35355338, %v1183_v13  ;;  %v5100_v16 = vpop.f32.mrb[15].mxu0  ;;  %v5105_v17 = vpop.f32.mrb[13].mxu1  ;;  %v1416_v18 = vmul.f32 0.35355338, %v1259_v14 }
 0x2a9   :  { %v2058_v17 = vlaneseq }
 0x2aa   :  { %v1419_v19 = vsel %vm1110_vm3, %v1415_v15, -inf  ;;  %v1422_v20 = vsel %vm1110_vm3, %v1416_v18, -inf }
 0x2ab   :  { %1420 = vmax.xlane.f32.xlu0 %v1419_v19 }
 0x2af   :  { %v1411_v21 = vpop.f32.mrb[14].mxu1  ;;  %1423 = vmax.xlane.f32.xlu0 %v1422_v20  ;;  %v1335_v22 = vpop.f32.mrb[16].mxu0  ;;  %v6184_v20 = vshrl.u32 %v2058_v17, 7 }
 0x2b0   :  { %v1417_v23 = vmul.f32 0.35355338, %v1335_v22  ;;  %v5110_v24 = vpop.f32.mrb[17].mxu0  ;;  %v5115_v25 = vpop.f32.mrb[15].mxu1  ;;  %v1418_v26 = vmul.f32 0.35355338, %v1411_v21 }
 0x2b2   :  { %v1425_v27 = vsel %vm1110_vm3, %v1417_v23, -inf  ;;  %v1428_v28 = vsel %vm1110_vm3, %v1418_v26, -inf }
 0x2b3   :  { %1426 = vmax.xlane.f32.xlu1 %v1425_v27 }
 0x2b7   :  { %1429 = vmax.xlane.f32.xlu1 %v1428_v28 }
 0x338   :  { %v1421_v29 = vpop.xlane.xlu0 %1420 }
 0x339   :  { %v1431_v30 = vsub.f32 %v1415_v15, %v1421_v29  ;;  %v6193_v29 = vld [vmem:[%s6780_s9] sm:$0x3f] }
 0x33b   :  { %v1435_v31 = vmul.f32 1.442695, %v1431_v30 }
 0x33c   :  { %v1424_v32 = vpop.xlane.xlu0 %1423 }
 0x33d   :  { %5677 = vpow2.f32 %v1435_v31  ;;  %v1432_v33 = vsub.f32 %v1416_v18, %v1424_v32 }
 0x33f   :  { %v1437_v34 = vmul.f32 1.442695, %v1432_v33 }
 0x340   :  { %v1427_v35 = vpop.xlane.xlu1 %1426 }
 0x341   :  { %5679 = vpow2.f32 %v1437_v34  ;;  %v1433_v36 = vsub.f32 %v1417_v23, %v1427_v35 }
 0x343   :  { %v1439_v37 = vmul.f32 1.442695, %v1433_v36 }
 0x344   :  { %v1430_v39 = vpop.xlane.xlu1 %1429 }
 0x345   :  { %5681 = vpow2.f32 %v1439_v37  ;;  %v1434_v40 = vsub.f32 %v1418_v26, %v1430_v39  ;;  %v2060_v26 = vsub.s32 0, %v6184_v20 }
 0x347   :  { %v5678_v41 = vpop.eup %5677  ;;  %v1441_v42 = vmul.f32 1.442695, %v1434_v40  ;;  %v2061_v32 = vrot.slane %v6193_v29, %v2060_v26 }
 0x348   :  { %v1443_v43 = vsel %vm1110_vm3, %v5678_v41, 0.0 }
 0x349   :  { %5683 = vpow2.f32 %v1441_v42  ;;  %1444 = vadd.xlane.f32.xlu0 %v1443_v43 }
 0x34b   :  { %v5680_v44 = vpop.eup %5679 }
 0x34c   :  { %v1446_v45 = vsel %vm1110_vm3, %v5680_v44, 0.0 }
 0x34d   :  { %1447 = vadd.xlane.f32.xlu1 %v1446_v45  ;;  %v2088_v45 = vld [vmem:[%s6777_s6] sm:$0xff] }
 0x34f   :  { %v5682_v46 = vpop.eup %5681 }
 0x350   :  { %v1449_v47 = vsel %vm1110_vm3, %v5682_v46, 0.0 }
 0x351   :  { %1450 = vadd.xlane.f32.xlu0 %v1449_v47 }
 0x353   :  { %v5684_v48 = vpop.eup %5683 }
 0x354   :  { %v1452_v49 = vsel %vm1110_vm3, %v5684_v48, 0.0 }
 0x355   :  { %1453 = vadd.xlane.f32.xlu1 %v1452_v49 }
 0x3d6   :  { %v1445_v50 = vpop.xlane.xlu0 %1444 }
 0x3d7   :  { %5685 = vrcp.f32 %v1445_v50  ;;  %v2173_v50 = vld [vmem:[%s6779_s8] sm:$0xff] }
 0x3da   :  { %v1448_v51 = vpop.xlane.xlu1 %1447 }
 0x3db   :  { %5687 = vrcp.f32 %v1448_v51  ;;  %v2174_v51 = vld [vmem:[%s6779_s8 + $0x8] sm:$0xff] }
 0x3dc   :  { %v5542_v53 = vpack.c.bf16 %v2174_v51, %v2173_v50  ;;  %v4593_v50 = vld [vmem:[%s6774_s3 + $0x198] sm:$0xff]  ;;  %v4608_v51 = vld [vmem:[%s6774_s3 + $0x210] sm:$0xff] }
 0x3de   :  { %v1451_v52 = vpop.xlane.xlu0 %1450 }
 0x3df   :  { %5689 = vrcp.f32 %v1451_v52  ;;  %v2175_v52 = vld [vmem:[%s6779_s8 + $0x10] sm:$0xff] }
 0x3e1   :  { %v5686_v54 = vpop.eup %5685 }
 0x3e2   :  { %v1459_v55 = vmul.f32 %v5686_v54, %v5678_v41  ;;  %v1454_v56 = vpop.xlane.xlu1 %1453  ;;  %v2176_v54 = vld [vmem:[%s6779_s8 + $0x18] sm:$0xff] }
 0x3e3   :  { %5691 = vrcp.f32 %v1454_v56  ;;  %v2177_v56 = vld [vmem:[%s6779_s8 + $0x20] sm:$0xff] }
 0x3e4   :  { %5119 = vmatmul.mubr.msk.f32.vlgmr.msra.gmra.mrb[18].mxu0 %vm1110_vm3, %v1459_v55  ;;  %v5545_v55 = vpack.c.bf16 %v2176_v54, %v2175_v52 }
 0x3e5   :  { %v5688_v59 = vpop.eup %5687  ;;  %5127 = vmatpush3.msra.mxu0 %v1037_v57  ;;  %5128 = vmatprep.mubr.msk.f32.mxu0 %vm5744_vm0, %v5745_v6  ;;  %v2178_v57 = vld [vmem:[%s6779_s8 + $0x28] sm:$0xff] }
 0x3e6   :  { %v1460_v60 = vmul.f32 %v5688_v59, %v5680_v44  ;;  %5136 = vmatprep.subr.mxu0 %v5745_v6  ;;  %v5548_v58 = vpack.c.bf16 %v2178_v57, %v2177_v56  ;;  %v2179_v59 = vld [vmem:[%s6779_s8 + $0x30] sm:$0xff] }
 0x3e8   :  { %5124 = vmatmul.mubr.msk.f32.vlgmr.msra.gmra.mrb[16].mxu1 %vm1110_vm3, %v1460_v60  ;;  %v2180_v60 = vld [vmem:[%s6779_s8 + $0x38] sm:$0xff] }
 0x3e9   :  { %v5690_v62 = vpop.eup %5689  ;;  %5132 = vmatpush3.msra.mxu1 %v1107_v61  ;;  %5133 = vmatprep.mubr.msk.f32.mxu1 %vm5744_vm0, %v5745_v6  ;;  %v5551_v61 = vpack.c.bf16 %v2180_v60, %v2179_v59  ;;  %v2284_v59 = vsub.s32 5, %v6184_v20 }
 0x3ea   :  { %v1461_v63 = vmul.f32 %v5690_v62, %v5682_v46  ;;  %5141 = vmatprep.subr.mxu1 %v5745_v6  ;;  %v2089_v46 = vld [vmem:[%s6777_s6 + $0x8] sm:$0xff]  ;;  %v2181_v62 = vld [vmem:[%s6779_s8 + $0x40] sm:$0xff] }
 0x3eb   :  { %v5536_v47 = vpack.c.bf16 %v2089_v46, %v2088_v45  ;;  %v4591_v45 = vld [vmem:[%s6774_s3 + $0x188] sm:$0xff]  ;;  %v4606_v46 = vld [vmem:[%s6774_s3 + $0x200] sm:$0xff] }
 0x3ec   :  { %5129 = vmatmul.mubr.msk.f32.vlgmr.msra.gmra.mrb[20].mxu0 %vm1110_vm3, %v1461_v63  ;;  %v2182_v63 = vld [vmem:[%s6779_s8 + $0x48] sm:$0xff] }
 0x3ed   :  { %v5692_v0 = vpop.eup %5691  ;;  %5138 = vmatprep.mubr.msk.f32.mxu0 %vm5744_vm0, %v5745_v6  ;;  %5137 = vmatpush3.msra.mxu0 %v1755_v2  ;;  %v2184_v2 = vld [vmem:[%s6779_s8 + $0x58] sm:$0xff] }
 0x3ee   :  { %v1462_v1 = vmul.f32 %v5692_v0, %v5684_v48  ;;  %5146 = vmatprep.subr.mxu0 %v5745_v6  ;;  %v2091_v48 = vld [vmem:[%s6777_s6 + $0x18] sm:$0xff]  ;;  %v5554_v0 = vpack.c.bf16 %v2182_v63, %v2181_v62  ;;  %v4594_v62 = vld [vmem:[%s6774_s3 + $0x1a0] sm:$0xff]  ;;  %v2285_v63 = vrot.slane %v6193_v29, %v2284_v59 }
 0x3f0   :  { %5134 = vmatmul.mubr.msk.f32.vlgmr.msra.gmra.mrb[18].mxu1 %vm1110_vm3, %v1462_v1  ;;  %v2183_v1 = vld [vmem:[%s6779_s8 + $0x50] sm:$0xff] }
 0x3f1   :  { %5143 = vmatprep.mubr.msk.f32.mxu1 %vm5744_vm0, %v5745_v6  ;;  %5142 = vmatpush3.msra.mxu1 %v1756_v4  ;;  %v5557_v4 = vpack.c.bf16 %v2184_v2, %v2183_v1  ;;  %v4595_v1 = vld [vmem:[%s6774_s3 + $0x1a8] sm:$0xff]  ;;  %v4614_v2 = vld [vmem:[%s6774_s3 + $0x240] sm:$0xff] }
 0x3f2   :  { %5151 = vmatprep.subr.mxu1 %v5745_v6 }
 0x4b7   :  { %v1532_v7 = vpop.f32.mrb[18].mxu0 }
 0x4b8   :  { %v5120_v8 = vpop.f32.mrb[19].mxu0  ;;  %5139 = vmatmul.mubr.msk.f32.vlgmr.msra.gmra.mrb[22].mxu0 %vm1110_vm3, %v1532_v7  ;;  %v2186_v7 = vld [vmem:[%s6779_s8 + $0x68] sm:$0xff] }
 0x4b9   :  { %5147 = vmatpush3.msra.mxu0 %v1757_v5  ;;  %5148 = vmatprep.mubr.msk.f32.mxu0 %vm5744_vm0, %v5745_v6  ;;  %v2185_v5 = vld [vmem:[%s6779_s8 + $0x60] sm:$0xff] }
 0x4ba   :  { %5535 = vmatprep.subr.bf16.mxu0 %v5743_v3  ;;  %v5560_v8 = vpack.c.bf16 %v2186_v7, %v2185_v5  ;;  %v5572_v7 = vpack.c.bf16 %v4595_v1, %v4594_v62  ;;  %v4628_v62 = vld [vmem:[%s6774_s3 + $0x2b0] sm:$0xff]  ;;  %v4634_v1 = vld [vmem:[%s6774_s3 + $0x2e0] sm:$0xff] }
 0x4bb   :  { %v1605_v10 = vpop.f32.mrb[16].mxu1 }
 0x4bc   :  { %v5125_v11 = vpop.f32.mrb[17].mxu1  ;;  %5144 = vmatmul.mubr.msk.f32.vlgmr.msra.gmra.mrb[20].mxu1 %vm1110_vm3, %v1605_v10 }
 0x4bd   :  { %5152 = vmatpush3.msra.mxu1 %v1758_v9  ;;  %5153 = vmatprep.mubr.msk.f32.mxu1 %vm5744_vm0, %v5745_v6 }
 0x4be   :  { %5541 = vmatprep.subr.bf16.mxu1 %v5743_v3 }
 0x4bf   :  { %v1678_v12 = vpop.f32.mrb[20].mxu0 }
 0x4c0   :  { %v5130_v13 = vpop.f32.mrb[21].mxu0  ;;  %5149 = vmatmul.mubr.msk.f32.vlgmr.msra.gmra.mrb[24].mxu0 %vm1110_vm3, %v1678_v12  ;;  %v2080_v12 = vsub.s32 1, %v6184_v20 }
 0x4c1   :  { %5164 = vmatprep.mubr.msk.f32.mxu0 %vm5744_vm0, %v5745_v6  ;;  %5537 = vmatpush3.bf16.msra.mxu0 %v5536_v47  ;;  %v2085_v13 = vsub.s32 2, %v6184_v20 }
 0x4c2   :  { %5538 = vmatprep.subr.bf16.mxu0 %v5743_v3 }
 0x4c3   :  { %v1751_v14 = vpop.f32.mrb[18].mxu1  ;;  %v2086_v17 = vrot.slane %v6193_v29, %v2085_v13 }
 0x4c4   :  { %v5135_v15 = vpop.f32.mrb[19].mxu1  ;;  %5154 = vmatmul.mubr.msk.f32.vlgmr.msra.gmra.mrb[22].mxu1 %vm1110_vm3, %v1751_v14  ;;  %v2081_v14 = vrot.slane %v6193_v29, %v2080_v12 }
 0x4c5   :  { %5199 = vmatprep.mubr.msk.f32.mxu1 %vm5744_vm0, %v5745_v6  ;;  %5543 = vmatpush3.bf16.msra.mxu1 %v5542_v53  ;;  %v4609_v53 = vld [vmem:[%s6774_s3 + $0x218] sm:$0xff] }
 0x4c6   :  { %5544 = vmatprep.subr.bf16.mxu1 %v5743_v3  ;;  %v5593_v54 = vpack.c.bf16 %v4609_v53, %v4608_v51  ;;  %v4618_v51 = vld [vmem:[%s6774_s3 + $0x260] sm:$0xff] }
 0x4c9   :  { %5546 = vmatpush3.bf16.msra.mxu1 %v5545_v55 }
 0x4ca   :  { %5547 = vmatprep.subr.bf16.mxu1 %v5743_v3 }
 0x4cd   :  { %5549 = vmatpush3.bf16.msra.mxu1 %v5548_v58  ;;  %v2279_v58 = vsub.s32 4, %v6184_v20 }
 0x4ce   :  { %5550 = vmatprep.subr.bf16.mxu1 %v5743_v3 }
 0x4cf   :  { %v2280_v60 = vrot.slane %v6193_v29, %v2279_v58 }
 0x4d1   :  { %5552 = vmatpush3.bf16.msra.mxu1 %v5551_v61 }
 0x4d2   :  { %5553 = vmatprep.subr.bf16.mxu1 %v5743_v3 }
 0x4d5   :  { %5555 = vmatpush3.bf16.msra.mxu1 %v5554_v0 }
 0x4d6   :  { %5556 = vmatprep.subr.bf16.mxu1 %v5743_v3 }
 0x4d9   :  { %5558 = vmatpush3.bf16.msra.mxu1 %v5557_v4  ;;  %v4615_v4 = vld [vmem:[%s6774_s3 + $0x248] sm:$0xff] }
 0x4da   :  { %5559 = vmatprep.subr.bf16.mxu1 %v5743_v3 }
 0x4dd   :  { %5561 = vmatpush3.bf16.msra.mxu1 %v5560_v8  ;;  %v5602_v8 = vpack.c.bf16 %v4615_v4, %v4614_v2  ;;  %v4635_v2 = vld [vmem:[%s6774_s3 + $0x2e8] sm:$0xff] }
 0x4de   :  { %5562 = vmatprep.subr.bf16.mxu1 %v5743_v3  ;;  %v5632_v4 = vpack.c.bf16 %v4635_v2, %v4634_v1 }
 0x58b   :  { %v1828_v16 = vpop.f32.mrb[22].mxu0 }
 0x58c   :  { %v5140_v18 = vpop.f32.mrb[23].mxu0  ;;  %v2051_v21 = vsel %vm266_vm2, %v1828_v16, 0.0 }
 0x58f   :  { %v1901_v19 = vpop.f32.mrb[20].mxu1 }
 0x590   :  { %v2052_v22 = vsel %vm266_vm2, %v1901_v19, 0.0  ;;  %v5145_v23 = vpop.f32.mrb[21].mxu1 }
 0x591   :  { %v2053_v24 = vadd.f32 %v2052_v22, %v2051_v21  ;;  %v2187_v21 = vld [vmem:[%s6779_s8 + $0x70] sm:$0xff]  ;;  %v2188_v22 = vld [vmem:[%s6779_s8 + $0x78] sm:$0xff] }
 0x592   :  { %v5563_v23 = vpack.c.bf16 %v2188_v22, %v2187_v21  ;;  %v4623_v21 = vld [vmem:[%s6774_s3 + $0x288] sm:$0xff] }
 0x593   :  { %v1974_v25 = vpop.f32.mrb[24].mxu0 }
 0x594   :  { %v2054_v27 = vsel %vm266_vm2, %v1974_v25, 0.0  ;;  %v5150_v28 = vpop.f32.mrb[25].mxu0  ;;  %5564 = vmatpush3.bf16.msra.mxu1 %v5563_v23 }
 0x595   :  { %v2055_v30 = vadd.f32 %v2054_v27, %v2053_v24  ;;  %5589 = vmatprep.subr.bf16.mxu1 %v5743_v3  ;;  %v4587_v24 = vld [vmem:[%s6778_s7] ss:$0 sm:$0xff] }
 0x597   :  { %v2047_v31 = vpop.f32.mrb[22].mxu1 }
 0x598   :  { %v2056_v33 = vsel %vm266_vm2, %v2047_v31, 0.0  ;;  %v5155_v34 = vpop.f32.mrb[23].mxu1  ;;  %v2191_v31 = vsub.s32 3, %v6184_v20 }
 0x599   :  { %v2057_v35 = vadd.f32 %v2056_v33, %v2055_v30 }
 0x59b   :  { %v2062_v36 = vadd.f32 %v2061_v32, %v2057_v35  ;;  %v2192_v32 = vrot.slane %v6193_v29, %v2191_v31  ;;  %v4596_v29 = vld [vmem:[%s6774_s3 + $0x1b0] sm:$0xff] }
 0x59d   :  { %v2063_v37 = vadd.f32 %v2062_v36, %v5898_v38  ;;  %v2090_v38 = vld [vmem:[%s6777_s6 + $0x10] sm:$0xff] }
 0x59e   :  { %v5539_v49 = vpack.c.bf16 %v2091_v48, %v2090_v38  ;;  %v4607_v38 = vld [vmem:[%s6774_s3 + $0x208] sm:$0xff] }
 0x59f   :  { %v2064_v39 = vsel %vm266_vm2, %v2063_v37, 0.0  ;;  %v5590_v48 = vpack.c.bf16 %v4607_v38, %v4606_v46  ;;  %v4610_v46 = vld [vmem:[%s6774_s3 + $0x220] sm:$0xff] }
 0x5a0   :  { %2065 = vadd.xlane.f32.xlu0 %v2064_v39  ;;  %5540 = vmatpush3.bf16.msra.mxu0 %v5539_v49  ;;  %v4592_v49 = vld [vmem:[%s6774_s3 + $0x190] sm:$0xff] }
 0x5a1   :  { %5565 = vmatprep.subr.bf16.mxu0 %v5743_v3  ;;  %v5569_v52 = vpack.c.bf16 %v4593_v50, %v4592_v49  ;;  %v4613_v49 = vld [vmem:[%s6774_s3 + $0x238] sm:$0xff] }
 0x62d   :  { %v2066_v40 = vpop.xlane.xlu0 %2065 }
 0x62e   :  { %v2068_v41 = vmul.f32 0.03125, %v2066_v40 }
 0x630   :  { %v2069_v42 = vsub.f32 %v2063_v37, %v2068_v41 }
 0x632   :  { %v2070_v43 = vmul.f32 %v2069_v42, %v2069_v42 }
 0x634   :  { %v2071_v44 = vsel %vm266_vm2, %v2070_v43, 0.0 }
 0x635   :  { %2072 = vadd.xlane.f32.xlu1 %v2071_v44  ;;  %v4590_v44 = vld [vmem:[%s6774_s3 + $0x180] sm:$0xff] }
 0x636   :  { %v5566_v47 = vpack.c.bf16 %v4591_v45, %v4590_v44 }
 0x6c2   :  { %v2073_v9 = vpop.xlane.xlu1 %2072 }
 0x6c3   :  { %v2074_v10 = vmul.f32 0.03125, %v2073_v9 }
 0x6c5   :  { %v2075_v11 = vadd.f32 1e-05, %v2074_v10  ;;  %v4597_v10 = vld [vmem:[%s6774_s3 + $0x1b8] sm:$0xff] }
 0x6c7   :  { %5693 = vrsqrt.f32 %v2075_v11  ;;  %v4616_v11 = vld [vmem:[%s6774_s3 + $0x250] sm:$0xff] }
 0x6d1   :  { %v5694_v15 = vpop.eup %5693 }
 0x6d2   :  { %v2077_v16 = vmul.f32 %v5694_v15, %v2069_v42  ;;  %v5575_v15 = vpack.c.bf16 %v4597_v10, %v4596_v29  ;;  %v4654_v29 = vld [vmem:[%s6775_s4 + $0x10] ss:$0 sm:$0xff] }
 0x6d4   :  { %v2082_v18 = vmul.f32 %v2081_v14, %v2077_v16  ;;  %v4617_v14 = vld [vmem:[%s6774_s3 + $0x258] sm:$0xff] }
 0x6d5   :  { %v5605_v16 = vpack.c.bf16 %v4617_v14, %v4616_v11  ;;  %v4650_v14 = vld [vmem:[%s6775_s4 + $0xc] ss:$0 sm:$0xff] }
 0x6d6   :  { %v2087_v19 = vadd.f32 %v2086_v17, %v2082_v18  ;;  %v4598_v17 = vld [vmem:[%s6774_s3 + $0x1c0] sm:$0xff]  ;;  %v4599_v18 = vld [vmem:[%s6774_s3 + $0x1c8] sm:$0xff] }
 0x6d7   :  { %v5578_v22 = vpack.c.bf16 %v4599_v18, %v4598_v17 }
 0x6d8   :  { %5165 = vmatmul.mubr.msk.f32.vlgmr.msra.gmra.mrb[26].mxu0 %vm266_vm2, %v2087_v19 }
 0x6d9   :  { %5210 = vmatprep.mubr.msk.f32.mxu0 %vm5744_vm0, %v5745_v6  ;;  %5567 = vmatpush3.bf16.msra.mxu0 %v5566_v47  ;;  %v4611_v47 = vld [vmem:[%s6774_s3 + $0x228] sm:$0xff] }
 0x6da   :  { %5568 = vmatprep.subr.bf16.mxu0 %v5743_v3  ;;  %v5596_v38 = vpack.c.bf16 %v4611_v47, %v4610_v46 }
 0x6dd   :  { %5570 = vmatpush3.bf16.msra.mxu0 %v5569_v52  ;;  %v4619_v52 = vld [vmem:[%s6774_s3 + $0x268] sm:$0xff] }
 0x6de   :  { %5571 = vmatprep.subr.bf16.mxu0 %v5743_v3  ;;  %v5608_v53 = vpack.c.bf16 %v4619_v52, %v4618_v51 }
 0x7ab   :  { %v2168_v25 = vpop.f32.mrb[26].mxu0 }
 0x7ac   :  { %v2169_v27 = vadd.f32 %v4587_v24, %v2168_v25  ;;  %v5166_v28 = vpop.f32.mrb[27].mxu0  ;;  %v4600_v24 = vld [vmem:[%s6774_s3 + $0x1d0] sm:$0xff]  ;;  %v4601_v25 = vld [vmem:[%s6774_s3 + $0x1d8] sm:$0xff] }
 0x7ad   :  { %v4625_v28 = vld [vmem:[%s6774_s3 + $0x298] sm:$0xff] }
 0x7ae   :  { %v2172_v30 = vmax.f32 %v2169_v27, 0.0  ;;  %v4624_v27 = vld [vmem:[%s6774_s3 + $0x290] sm:$0xff] }
 0x7b0   :  { %5200 = vmatmul.mubr.f32.vlgmr.msra.gmra.mrb[24].mxu1 %v2172_v30  ;;  %v5581_v30 = vpack.c.bf16 %v4601_v25, %v4600_v24 }
 0x7b1   :  { %5254 = vmatprep.mubr.msk.f32.mxu1 %vm5744_vm0, %v5745_v6  ;;  %5591 = vmatpush3.bf16.msra.mxu1 %v5590_v48  ;;  %v4612_v48 = vld [vmem:[%s6774_s3 + $0x230] sm:$0xff] }
 0x7b2   :  { %5592 = vmatprep.subr.bf16.mxu1 %v5743_v3  ;;  %v5599_v50 = vpack.c.bf16 %v4613_v49, %v4612_v48  ;;  %v4653_v49 = vld [vmem:[%s6775_s4 + $0xf] ss:$0 sm:$0xff] }
 0x7b5   :  { %5594 = vmatpush3.bf16.msra.mxu1 %v5593_v54  ;;  %v4620_v54 = vld [vmem:[%s6774_s3 + $0x270] sm:$0xff] }
 0x7b6   :  { %5601 = vmatprep.subr.bf16.mxu1 %v5743_v3 }
 0x883   :  { %v2259_v33 = vpop.f32.mrb[24].mxu1 }
 0x884   :  { %v2260_v34 = vadd.f32 %v2259_v33, %v2192_v32  ;;  %v5201_v35 = vpop.f32.mrb[25].mxu1  ;;  %v5617_v32 = vpack.c.bf16 %v4625_v28, %v4624_v27  ;;  %v4602_v33 = vld [vmem:[%s6774_s3 + $0x1e0] sm:$0xff]  ;;  %v4652_v27 = vld [vmem:[%s6775_s4 + $0xe] ss:$0 sm:$0xff]  ;;  %v4658_v28 = vld [vmem:[%s6775_s4 + $0x14] ss:$0 sm:$0xff] }
 0x885   :  { %v4630_v35 = vld [vmem:[%s6774_s3 + $0x2c0] sm:$0xff] }
 0x886   :  { %v2263_v36 = vadd.f32 %v2260_v34, %v2087_v19  ;;  %v4622_v19 = vld [vmem:[%s6774_s3 + $0x280] sm:$0xff]  ;;  %v4603_v34 = vld [vmem:[%s6774_s3 + $0x1e8] sm:$0xff] }
 0x887   :  { %v5614_v23 = vpack.c.bf16 %v4623_v21, %v4622_v19  ;;  %v4656_v19 = vld [vmem:[%s6775_s4 + $0x12] ss:$0 sm:$0xff] }
 0x888   :  { %v2264_v37 = vsel %vm266_vm2, %v2263_v36, 0.0 }
 0x889   :  { %2265 = vadd.xlane.f32.xlu0 %v2264_v37  ;;  %v5584_v37 = vpack.c.bf16 %v4603_v34, %v4602_v33 }
 0x916   :  { %v2266_v39 = vpop.xlane.xlu0 %2265 }
 0x917   :  { %v2267_v40 = vmul.f32 0.03125, %v2266_v39 }
 0x919   :  { %v2268_v41 = vsub.f32 %v2263_v36, %v2267_v40  ;;  %v4631_v36 = vld [vmem:[%s6774_s3 + $0x2c8] sm:$0xff]  ;;  %v4604_v40 = vld [vmem:[%s6774_s3 + $0x1f0] sm:$0xff] }
 0x91a   :  { %v5626_v39 = vpack.c.bf16 %v4631_v36, %v4630_v35 }
 0x91b   :  { %v2269_v42 = vmul.f32 %v2268_v41, %v2268_v41 }
 0x91d   :  { %v2270_v43 = vsel %vm266_vm2, %v2269_v42, 0.0  ;;  %v4632_v42 = vld [vmem:[%s6774_s3 + $0x2d0] sm:$0xff] }
 0x91e   :  { %2271 = vadd.xlane.f32.xlu1 %v2270_v43  ;;  %v4633_v43 = vld [vmem:[%s6774_s3 + $0x2d8] sm:$0xff] }
 0x91f   :  { %v5629_v45 = vpack.c.bf16 %v4633_v43, %v4632_v42  ;;  %v4655_v42 = vld [vmem:[%s6775_s4 + $0x11] ss:$0 sm:$0xff] }
 0x9ab   :  { %v2272_v55 = vpop.xlane.xlu1 %2271 }
 0x9ac   :  { %v2273_v56 = vmul.f32 0.03125, %v2272_v55  ;;  %v4621_v55 = vld [vmem:[%s6774_s3 + $0x278] sm:$0xff] }
 0x9ae   :  { %v2274_v57 = vadd.f32 1e-05, %v2273_v56  ;;  %v5611_v56 = vpack.c.bf16 %v4621_v55, %v4620_v54 }
 0x9b0   :  { %5695 = vrsqrt.f32 %v2274_v57  ;;  %v4626_v57 = vld [vmem:[%s6774_s3 + $0x2a0] sm:$0xff] }
 0x9ba   :  { %v5696_v61 = vpop.eup %5695 }
 0x9bb   :  { %v2276_v0 = vmul.f32 %v5696_v61, %v2268_v41  ;;  %v4605_v41 = vld [vmem:[%s6774_s3 + $0x1f8] sm:$0xff] }
 0x9bc   :  { %v5587_v44 = vpack.c.bf16 %v4605_v41, %v4604_v40 }
 0x9bd   :  { %v2281_v5 = vmul.f32 %v2280_v60, %v2276_v0  ;;  %v4627_v60 = vld [vmem:[%s6774_s3 + $0x2a8] sm:$0xff] }
 0x9be   :  { %v5620_v61 = vpack.c.bf16 %v4627_v60, %v4626_v57 }
 0x9bf   :  { %v6345_v9 = vadd.f32 %v2285_v63, %v2281_v5  ;;  %v4629_v63 = vld [vmem:[%s6774_s3 + $0x2b8] sm:$0xff]  ;;  %v4636_v5 = vld [vmem:[%s6774_s3 + $0x2f0] sm:$0xff] }
 0x9c0   :  { %v5623_v0 = vpack.c.bf16 %v4629_v63, %v4628_v62 }
 0x9c1   :  { %5211 = vmatmul.mubr.msk.f32.vlgmr.msra.gmra.mrb[28].mxu0 %vm266_vm2, %v6345_v9  ;;  %5255 = vmatmul.mubr.msk.f32.vlgmr.msra.gmra.mrb[26].mxu1 %vm266_vm2, %v6345_v9 }
 0x9c2   :  { %5573 = vmatpush3.bf16.msra.mxu0 %v5572_v7  ;;  %5603 = vmatpush3.bf16.msra.mxu1 %v5602_v8  ;;  %v4637_v7 = vld [vmem:[%s6774_s3 + $0x2f8] sm:$0xff] }
 0x9c3   :  { %5574 = vmatprep.subr.bf16.mxu0 %v5743_v3  ;;  %5604 = vmatprep.subr.bf16.mxu1 %v5743_v3  ;;  %v5635_v8 = vpack.c.bf16 %v4637_v7, %v4636_v5 }
 0x9c4   :  { %5221 = vmatprep.mubr.msk.f32.mxu0 %vm5744_vm0, %v5745_v6  ;;  %5276 = vmatprep.mubr.msk.f32.mxu1 %vm5744_vm0, %v5745_v6 }
 0x9c6   :  { %5576 = vmatpush3.bf16.msra.mxu0 %v5575_v15  ;;  %5606 = vmatpush3.bf16.msra.mxu1 %v5605_v16 }
 0x9c7   :  { %5577 = vmatprep.subr.bf16.mxu0 %v5743_v3  ;;  %5613 = vmatprep.subr.bf16.mxu1 %v5743_v3 }
 0x9c9   :  { %5222 = vmatmul.mubr.msk.f32.vlgmr.msra.gmra.mrb[30].mxu0 %vm266_vm2, %v6345_v9  ;;  %5277 = vmatmul.mubr.msk.f32.vlgmr.msra.gmra.mrb[28].mxu1 %vm266_vm2, %v6345_v9 }
 0x9ca   :  { %5579 = vmatpush3.bf16.msra.mxu0 %v5578_v22  ;;  %5615 = vmatpush3.bf16.msra.mxu1 %v5614_v23 }
 0x9cb   :  { %5580 = vmatprep.subr.bf16.mxu0 %v5743_v3  ;;  %5616 = vmatprep.subr.bf16.mxu1 %v5743_v3 }
 0x9cc   :  { %5232 = vmatprep.mubr.msk.f32.mxu0 %vm5744_vm0, %v5745_v6  ;;  %5298 = vmatprep.mubr.msk.f32.mxu1 %vm5744_vm0, %v5745_v6 }
 0x9ce   :  { %5582 = vmatpush3.bf16.msra.mxu0 %v5581_v30  ;;  %5618 = vmatpush3.bf16.msra.mxu1 %v5617_v32 }
 0x9cf   :  { %5583 = vmatprep.subr.bf16.mxu0 %v5743_v3  ;;  %5625 = vmatprep.subr.bf16.mxu1 %v5743_v3 }
 0x9d1   :  { %5233 = vmatmul.mubr.msk.f32.vlgmr.msra.gmra.mrb[32].mxu0 %vm266_vm2, %v6345_v9  ;;  %5299 = vmatmul.mubr.msk.f32.vlgmr.msra.gmra.mrb[30].mxu1 %vm266_vm2, %v6345_v9 }
 0x9d2   :  { %5585 = vmatpush3.bf16.msra.mxu0 %v5584_v37  ;;  %5627 = vmatpush3.bf16.msra.mxu1 %v5626_v39 }
 0x9d3   :  { %5586 = vmatprep.subr.bf16.mxu0 %v5743_v3  ;;  %5628 = vmatprep.subr.bf16.mxu1 %v5743_v3 }
 0x9d4   :  { %5243 = vmatprep.mubr.msk.f32.mxu0 %vm5744_vm0, %v5745_v6  ;;  %5320 = vmatprep.mubr.msk.f32.mxu1 %vm5744_vm0, %v5745_v6 }
 0x9d6   :  { %5588 = vmatpush3.bf16.msra.mxu0 %v5587_v44  ;;  %5630 = vmatpush3.bf16.msra.mxu1 %v5629_v45  ;;  %v4651_v44 = vld [vmem:[%s6775_s4 + $0xd] ss:$0 sm:$0xff] }
 0x9d7   :  { %5595 = vmatprep.subr.bf16.mxu0 %v5743_v3  ;;  %5334 = vmatprep.subr.mxu1 %v5745_v6 }
 0x9d9   :  { %5244 = vmatmul.mubr.msk.f32.vlgmr.msra.gmra.mrb[34].mxu0 %vm266_vm2, %v6345_v9  ;;  %5321 = vmatmul.mubr.msk.f32.vlgmr.msra.gmra.mrb[32].mxu1 %vm266_vm2, %v6345_v9 }
 0x9da   :  { %5597 = vmatpush3.bf16.msra.mxu0 %v5596_v38  ;;  %5265 = vmatprep.mubr.msk.f32.mxu0 %vm5744_vm0, %v5745_v6  ;;  %v4657_v38 = vld [vmem:[%s6775_s4 + $0x13] ss:$0 sm:$0xff] }
 0x9db   :  { %5598 = vmatprep.subr.bf16.mxu0 %v5743_v3  ;;  %5336 = vmatprep.mubr.msk.f32.mxu1 %vm5744_vm0, %v5745_v6 }
 0x9de   :  { %5600 = vmatpush3.bf16.msra.mxu0 %v5599_v50 }
 0x9df   :  { %5607 = vmatprep.subr.bf16.mxu0 %v5743_v3 }
 0x9e1   :  { %5266 = vmatmul.mubr.msk.f32.vlgmr.msra.gmra.mrb[36].mxu0 %vm266_vm2, %v6345_v9 }
 0x9e2   :  { %5609 = vmatpush3.bf16.msra.mxu0 %v5608_v53  ;;  %5287 = vmatprep.mubr.msk.f32.mxu0 %vm5744_vm0, %v5745_v6  ;;  %v4659_v53 = vld [vmem:[%s6775_s4 + $0x15] ss:$0 sm:$0xff] }
 0x9e3   :  { %5610 = vmatprep.subr.bf16.mxu0 %v5743_v3 }
 0x9e6   :  { %5612 = vmatpush3.bf16.msra.mxu0 %v5611_v56 }
 0x9e7   :  { %5619 = vmatprep.subr.bf16.mxu0 %v5743_v3 }
 0x9e9   :  { %5288 = vmatmul.mubr.msk.f32.vlgmr.msra.gmra.mrb[38].mxu0 %vm266_vm2, %v6345_v9 }
 0x9ea   :  { %5621 = vmatpush3.bf16.msra.mxu0 %v5620_v61  ;;  %5309 = vmatprep.mubr.msk.f32.mxu0 %vm5744_vm0, %v5745_v6 }
 0x9eb   :  { %5622 = vmatprep.subr.bf16.mxu0 %v5743_v3 }
 0x9ee   :  { %5624 = vmatpush3.bf16.msra.mxu0 %v5623_v0 }
 0x9ef   :  { %5631 = vmatprep.subr.bf16.mxu0 %v5743_v3 }
 0x9f1   :  { %5310 = vmatmul.mubr.msk.f32.vlgmr.msra.gmra.mrb[40].mxu0 %vm266_vm2, %v6345_v9 }
 0x9f2   :  { %5633 = vmatpush3.bf16.msra.mxu0 %v5632_v4  ;;  %5331 = vmatprep.mubr.msk.f32.mxu0 %vm5744_vm0, %v5745_v6 }
 0x9f3   :  { %5634 = vmatprep.subr.bf16.mxu0 %v5743_v3 }
 0x9f6   :  { %5636 = vmatpush3.bf16.msra.mxu0 %v5635_v8 }
 0x9f7   :  { %5344 = vmatprep.subr.mxu0 %v5745_v6 }
 0x9f9   :  { %5332 = vmatmul.mubr.msk.f32.vlgmr.msra.gmra.mrb[42].mxu0 %vm266_vm2, %v6345_v9 }
 0x9fa   :  { %5346 = vmatprep.mubr.msk.f32.mxu0 %vm5744_vm0, %v5745_v6 }
 0xa94   :  { %v2492_v10 = vpop.f32.mrb[28].mxu0  ;;  %v2772_v11 = vpop.f32.mrb[26].mxu1 }
 0xa95   :  { %v2773_v15 = vadd.f32 %v4654_v29, %v2772_v11  ;;  %v5212_v16 = vpop.f32.mrb[29].mxu0  ;;  %v5256_v17 = vpop.f32.mrb[27].mxu1  ;;  %v2493_v18 = vadd.f32 %v4650_v14, %v2492_v10 }
 0xa97   :  { %5335 = vmatpush3.xpose.msk.msra.mxu1 %vm1110_vm3, %v2773_v15 }
 0xa98   :  { %5339 = vmatprep.subr.mxu1 %v5745_v6 }
 0xa9a   :  { %5337 = vmatmul.mubr.msk.f32.vlgmr.msra.gmra.mrb[34].mxu1 %vm1110_vm3, %v2493_v18 }
 0xa9b   :  { %5341 = vmatprep.mubr.msk.f32.mxu1 %vm5744_vm0, %v5745_v6 }
 0xa9c   :  { %v2562_v21 = vpop.f32.mrb[30].mxu0  ;;  %v2912_v22 = vpop.f32.mrb[28].mxu1 }
 0xa9d   :  { %v2913_v23 = vadd.f32 %v4656_v19, %v2912_v22  ;;  %v5223_v24 = vpop.f32.mrb[31].mxu0  ;;  %v5278_v25 = vpop.f32.mrb[29].mxu1  ;;  %v2563_v47 = vadd.f32 %v4651_v44, %v2562_v21  ;;  %v4660_v44 = vld [vmem:[%s6775_s4 + $0x16] ss:$0 sm:$0xff] }
 0xa9f   :  { %5345 = vmatpush3.xpose.msk.msra.mxu0 %vm1110_vm3, %v2913_v23 }
 0xaa0   :  { %5354 = vmatprep.subr.mxu0 %v5745_v6 }
 0xaa4   :  { %v2632_v30 = vpop.f32.mrb[32].mxu0  ;;  %v3052_v32 = vpop.f32.mrb[30].mxu1 }
 0xaa5   :  { %v2633_v33 = vadd.f32 %v4652_v27, %v2632_v30  ;;  %v3053_v34 = vadd.f32 %v4658_v28, %v3052_v32  ;;  %v5234_v35 = vpop.f32.mrb[33].mxu0  ;;  %v5300_v36 = vpop.f32.mrb[31].mxu1 }
 0xaa7   :  { %5347 = vmatmul.mubr.msk.f32.vlgmr.msra.gmra.mrb[44].mxu0 %vm1110_vm3, %v2633_v33 }
 0xaa8   :  { %5355 = vmatpush3.msra.mxu0 %v3053_v34  ;;  %5356 = vmatprep.mubr.msk.f32.mxu0 %vm5744_vm0, %v5745_v6 }
 0xaa9   :  { %5364 = vmatprep.subr.mxu0 %v5745_v6 }
 0xaac   :  { %v2702_v37 = vpop.f32.mrb[34].mxu0  ;;  %v6546_v39 = vpop.f32.mrb[32].mxu1 }
 0xaad   :  { %v5245_v40 = vpop.f32.mrb[35].mxu0  ;;  %v5322_v41 = vpop.f32.mrb[33].mxu1  ;;  %v2703_v52 = vadd.f32 %v4653_v49, %v2702_v37 }
 0xab4   :  { %v2842_v43 = vpop.f32.mrb[36].mxu0 }
 0xab5   :  { %v2843_v45 = vadd.f32 %v4655_v42, %v2842_v43  ;;  %v5267_v46 = vpop.f32.mrb[37].mxu0 }
 0xab7   :  { %5340 = vmatpush3.xpose.msk.msra.mxu1 %vm1110_vm3, %v2843_v45 }
 0xab8   :  { %5349 = vmatprep.subr.mxu1 %v5745_v6 }
 0xaba   :  { %5342 = vmatmul.mubr.msk.f32.vlgmr.msra.gmra.mrb[36].mxu1 %vm1110_vm3, %v2563_v47  ;;  %v3193_v47 = vadd.f32 %v4660_v44, %v6546_v39  ;;  %v4697_v44 = vld [vmem:[%s6777_s6 + $0x38] sm:$0xff] }
 0xabb   :  { %5351 = vmatprep.mubr.msk.f32.mxu1 %vm5744_vm0, %v5745_v6 }
 0xabc   :  { %v2982_v48 = vpop.f32.mrb[38].mxu0 }
 0xabd   :  { %v2983_v50 = vadd.f32 %v4657_v38, %v2982_v48  ;;  %v5289_v51 = vpop.f32.mrb[39].mxu0 }
 0xabe   :  { %v4661_v51 = vld [vmem:[%s6775_s4 + $0x17] ss:$0 sm:$0xff] }
 0xabf   :  { %5350 = vmatpush3.xpose.msk.msra.mxu1 %vm1110_vm3, %v2983_v50 }
 0xac0   :  { %5359 = vmatprep.subr.mxu1 %v5745_v6 }
 0xac2   :  { %5352 = vmatmul.mubr.msk.f32.vlgmr.msra.gmra.mrb[38].mxu1 %vm1110_vm3, %v2703_v52 }
 0xac3   :  { %5361 = vmatprep.mubr.msk.f32.mxu1 %vm5744_vm0, %v5745_v6 }
 0xac4   :  { %v3122_v54 = vpop.f32.mrb[40].mxu0 }
 0xac5   :  { %v3123_v55 = vadd.f32 %v4659_v53, %v3122_v54  ;;  %v5311_v56 = vpop.f32.mrb[41].mxu0 }
 0xac7   :  { %5360 = vmatpush3.msra.mxu1 %v3123_v55 }
 0xac8   :  { %5369 = vmatprep.subr.mxu1 %v5745_v6 }
 0xacc   :  { %v6574_v57 = vpop.f32.mrb[42].mxu0 }
 0xacd   :  { %v5333_v60 = vpop.f32.mrb[43].mxu0  ;;  %v3263_v54 = vadd.f32 %v4661_v51, %v6574_v57  ;;  %v4687_v57 = vld [vmem:[%s6776_s5 + $0x28] sm:$0xff] }
 0xace   :  { %v4686_v60 = vld [vmem:[%s6776_s5 + $0x20] sm:$0xff]  ;;  %v4706_v51 = vld [vmem:[%s6779_s8 + $0xa8] sm:$0xff] }
 0xb6d   :  { %v3338_v61 = vpop.f32.mrb[34].mxu1 }
 0xb6e   :  { %v3570_v62 = vmul.f32 0.35355338, %v3338_v61  ;;  %v5338_v63 = vpop.f32.mrb[35].mxu1  ;;  %v4688_v61 = vld [vmem:[%s6776_s5 + $0x30] sm:$0xff] }
 0xb70   :  { %v3574_v0 = vsel %vm1110_vm3, %v3570_v62, -inf }
 0xb71   :  { %3575 = vmax.xlane.f32.xlu0 %v3574_v0 }
 0xb7a   :  { %v3490_v1 = vpop.f32.mrb[44].mxu0 }
 0xb7b   :  { %v3572_v2 = vmul.f32 0.35355338, %v3490_v1  ;;  %v5348_v4 = vpop.f32.mrb[45].mxu0 }
 0xb7d   :  { %v3580_v5 = vsel %vm1110_vm3, %v3572_v2, -inf }
 0xb7e   :  { %3581 = vmax.xlane.f32.xlu0 %v3580_v5 }
 0xb8d   :  { %v3414_v7 = vpop.f32.mrb[36].mxu1 }
 0xb8e   :  { %v3571_v8 = vmul.f32 0.35355338, %v3414_v7  ;;  %v5343_v29 = vpop.f32.mrb[37].mxu1 }
 0xb90   :  { %v3577_v10 = vsel %vm1110_vm3, %v3571_v8, -inf }
 0xb91   :  { %3578 = vmax.xlane.f32.xlu1 %v3577_v10 }
 0xb95   :  { %v3566_v11 = vpop.f32.mrb[38].mxu1 }
 0xb96   :  { %v3573_v14 = vmul.f32 0.35355338, %v3566_v11  ;;  %v5353_v15 = vpop.f32.mrb[39].mxu1 }
 0xb98   :  { %v3583_v16 = vsel %vm1110_vm3, %v3573_v14, -inf }
 0xb99   :  { %3584 = vmax.xlane.f32.xlu1 %v3583_v16 }
 0xbfe   :  { %v3576_v17 = vpop.xlane.xlu0 %3575 }
 0xbff   :  { %v3586_v18 = vsub.f32 %v3570_v62, %v3576_v17 }
 0xc01   :  { %v3590_v19 = vmul.f32 1.442695, %v3586_v18 }
 0xc03   :  { %5697 = vpow2.f32 %v3590_v19 }
 0xc0b   :  { %v3582_v21 = vpop.xlane.xlu0 %3581 }
 0xc0c   :  { %v3588_v22 = vsub.f32 %v3572_v2, %v3582_v21  ;;  %v4689_v2 = vld [vmem:[%s6776_s5 + $0x38] sm:$0xff]  ;;  %s4537_s5 = sshll.u32 %s5746_s26, 4  ;;  %s4538_s5 = int_to_ptr.vmem [resolvable:$true] %s4537_s5 }
 0xc0d   :  { %v5698_v23 = vpop.eup %5697  ;;  %s5719_s2 = scalar_lea.vmem %s4538_s5, 128  ;;  %p5724_p1 = scmp.lt.s32.totalorder %s4538_s5, %s4538_s5 }
 0xc0e   :  { %v3594_v24 = vmul.f32 1.442695, %v3588_v22  ;;  %v3598_v25 = vsel %vm1110_vm3, %v5698_v23, 0.0  ;;  %p5720_p0 = scmp.ne.s32.totalorder %s4538_s5, %s5719_s2  ;;  %p5725_p2 = scmp.lt.s32.totalorder %s5719_s2, %s5719_s2 }
 0xc0f   :  { %3599 = vadd.xlane.f32.xlu0 %v3598_v25 }
 0xc10   :  { %5699 = vpow2.f32 %v3594_v24  ;;  %p5726_p3 = por %p5725_p2, %p5724_p1 }
 0xc12   :  { %p5727_p4 = pnand %p5726_p3, %p5720_p0 }
 0xc1a   :  { %v5700_v27 = vpop.eup %5699 }
 0xc1b   :  { %v3604_v28 = vsel %vm1110_vm3, %v5700_v27, 0.0 }
 0xc1c   :  { %3605 = vadd.xlane.f32.xlu0 %v3604_v28 }
 0xc1e   :  { %v3579_v30 = vpop.xlane.xlu1 %3578 }
 0xc1f   :  { %v3587_v32 = vsub.f32 %v3571_v8, %v3579_v30 }
 0xc21   :  { %v3592_v33 = vmul.f32 1.442695, %v3587_v32 }
 0xc23   :  { %5701 = vpow2.f32 %v3592_v33 }
 0xc26   :  { %v3585_v34 = vpop.xlane.xlu1 %3584 }
 0xc27   :  { %v3589_v35 = vsub.f32 %v3573_v14, %v3585_v34 }
 0xc29   :  { %v3596_v36 = vmul.f32 1.442695, %v3589_v35 }
 0xc2b   :  { %5703 = vpow2.f32 %v3596_v36 }
 0xc2d   :  { %v5702_v37 = vpop.eup %5701 }
 0xc2e   :  { %v3601_v40 = vsel %vm1110_vm3, %v5702_v37, 0.0 }
 0xc2f   :  { %3602 = vadd.xlane.f32.xlu1 %v3601_v40 }
 0xc35   :  { %v5704_v41 = vpop.eup %5703 }
 0xc36   :  { %v3607_v42 = vsel %vm1110_vm3, %v5704_v41, 0.0 }
 0xc37   :  { %3608 = vadd.xlane.f32.xlu1 %v3607_v42  ;;  %v4695_v42 = vld [vmem:[%s6777_s6 + $0x28] sm:$0xff] }
 0xc9c   :  { %v3600_v43 = vpop.xlane.xlu0 %3599 }
 0xc9d   :  { %5705 = vrcp.f32 %v3600_v43 }
 0xca7   :  { %v5706_v45 = vpop.eup %5705 }
 0xca8   :  { %v3614_v46 = vmul.f32 %v5706_v45, %v5698_v23  ;;  %v6640_v23 = vld [vmem:[%s6780_s9 + $0x8] sm:$0x3f] }
 0xca9   :  { %v3606_v38 = vpop.xlane.xlu0 %3605  ;;  %v4217_v25 = vrot.slane %v6640_v23, %v2060_v26  ;;  %v4694_v26 = vld [vmem:[%s6777_s6 + $0x20] sm:$0xff] }
 0xcaa   :  { %5707 = vrcp.f32 %v3606_v38  ;;  %5357 = vmatmul.mubr.msk.f32.vlgmr.msra.gmra.mrb[46].mxu0 %vm1110_vm3, %v3614_v46  ;;  %v5638_v43 = vpack.c.bf16 %v4695_v42, %v4694_v26  ;;  %v4701_v46 = vld [vmem:[%s6779_s8 + $0x80] sm:$0xff]  ;;  %v4703_v38 = vld [vmem:[%s6779_s8 + $0x90] sm:$0xff]  ;;  %v4448_v26 = vld [vmem:[%s6781_s10 + $0x18] sm:$0xff] }
 0xcab   :  { %5365 = vmatpush3.msra.mxu0 %v3193_v47  ;;  %5366 = vmatprep.mubr.msk.f32.mxu0 %vm5744_vm0, %v5745_v6  ;;  %v4702_v47 = vld [vmem:[%s6779_s8 + $0x88] sm:$0xff] }
 0xcac   :  { %5374 = vmatprep.subr.mxu0 %v5745_v6 }
 0xcb4   :  { %v5708_v48 = vpop.eup %5707 }
 0xcb5   :  { %v3616_v49 = vmul.f32 %v5708_v48, %v5700_v27  ;;  %v5644_v48 = vpack.c.bf16 %v4702_v47, %v4701_v46  ;;  %v4443_v47 = vrot.slane %v6640_v23, %v2284_v59 }
 0xcb7   :  { %5367 = vmatmul.mubr.msk.f32.vlgmr.msra.gmra.mrb[48].mxu0 %vm1110_vm3, %v3616_v49  ;;  %v4704_v49 = vld [vmem:[%s6779_s8 + $0x98] sm:$0xff] }
 0xcb8   :  { %5376 = vmatprep.mubr.msk.f32.mxu0 %vm5744_vm0, %v5745_v6  ;;  %5375 = vmatpush3.msra.mxu0 %v4686_v60  ;;  %v4710_v60 = vld [vmem:[%s6779_s8 + $0xc8] sm:$0xff] }
 0xcb9   :  { %5384 = vmatprep.subr.mxu0 %v5745_v6 }
 0xcbc   :  { %v3603_v50 = vpop.xlane.xlu1 %3602 }
 0xcbd   :  { %5709 = vrcp.f32 %v3603_v50  ;;  %v5647_v50 = vpack.c.bf16 %v4704_v49, %v4703_v38  ;;  %v4717_v49 = vld [vmem:[%s6782_s11] ss:$0 sm:$0xff] }
 0xcc4   :  { %v3609_v39 = vpop.xlane.xlu1 %3608 }
 0xcc5   :  { %5711 = vrcp.f32 %v3609_v39  ;;  %v4705_v39 = vld [vmem:[%s6779_s8 + $0xa0] sm:$0xff] }
 0xcc7   :  { %v5710_v52 = vpop.eup %5709 }
 0xcc8   :  { %v3615_v53 = vmul.f32 %v5710_v52, %v5702_v37  ;;  %v5650_v52 = vpack.c.bf16 %v4706_v51, %v4705_v39 }
 0xcca   :  { %5362 = vmatmul.mubr.msk.f32.vlgmr.msra.gmra.mrb[40].mxu1 %vm1110_vm3, %v3615_v53  ;;  %v4707_v53 = vld [vmem:[%s6779_s8 + $0xb0] sm:$0xff] }
 0xccb   :  { %5370 = vmatpush3.msra.mxu1 %v3263_v54  ;;  %5371 = vmatprep.mubr.msk.f32.mxu1 %vm5744_vm0, %v5745_v6  ;;  %v4708_v54 = vld [vmem:[%s6779_s8 + $0xb8] sm:$0xff] }
 0xccc   :  { %5379 = vmatprep.subr.mxu1 %v5745_v6 }
 0xccf   :  { %v5712_v55 = vpop.eup %5711 }
 0xcd0   :  { %v3617_v56 = vmul.f32 %v5712_v55, %v5704_v41  ;;  %v5653_v55 = vpack.c.bf16 %v4708_v54, %v4707_v53 }
 0xcd2   :  { %5372 = vmatmul.mubr.msk.f32.vlgmr.msra.gmra.mrb[42].mxu1 %vm1110_vm3, %v3617_v56  ;;  %v4709_v56 = vld [vmem:[%s6779_s8 + $0xc0] sm:$0xff] }
 0xcd3   :  { %5381 = vmatprep.mubr.msk.f32.mxu1 %vm5744_vm0, %v5745_v6  ;;  %5380 = vmatpush3.msra.mxu1 %v4687_v57  ;;  %v5656_v57 = vpack.c.bf16 %v4710_v60, %v4709_v56 }
 0xcd4   :  { %5389 = vmatprep.subr.mxu1 %v5745_v6 }
 0xd7d   :  { %v3687_v62 = vpop.f32.mrb[46].mxu0 }
 0xd7e   :  { %v5358_v63 = vpop.f32.mrb[47].mxu0  ;;  %5377 = vmatmul.mubr.msk.f32.vlgmr.msra.gmra.mrb[50].mxu0 %vm1110_vm3, %v3687_v62  ;;  %v4712_v62 = vld [vmem:[%s6779_s8 + $0xd8] sm:$0xff] }
 0xd7f   :  { %5385 = vmatpush3.msra.mxu0 %v4688_v61  ;;  %5386 = vmatprep.mubr.msk.f32.mxu0 %vm5744_vm0, %v5745_v6  ;;  %v4711_v61 = vld [vmem:[%s6779_s8 + $0xd0] sm:$0xff] }
 0xd80   :  { %5637 = vmatprep.subr.bf16.mxu0 %v5743_v3  ;;  %v5659_v63 = vpack.c.bf16 %v4712_v62, %v4711_v61 }
 0xd8a   :  { %v3833_v0 = vpop.f32.mrb[48].mxu0 }
 0xd8b   :  { %v5368_v1 = vpop.f32.mrb[49].mxu0  ;;  %5387 = vmatmul.mubr.msk.f32.vlgmr.msra.gmra.mrb[52].mxu0 %vm1110_vm3, %v3833_v0  ;;  %v4713_v0 = vld [vmem:[%s6779_s8 + $0xe0] sm:$0xff] }
 0xd8c   :  { %5402 = vmatprep.mubr.msk.f32.mxu0 %vm5744_vm0, %v5745_v6  ;;  %5639 = vmatpush3.bf16.msra.mxu0 %v5638_v43  ;;  %v4714_v1 = vld [vmem:[%s6779_s8 + $0xe8] sm:$0xff] }
 0xd8d   :  { %5640 = vmatprep.subr.bf16.mxu0 %v5743_v3 }
 0xd9d   :  { %v3760_v4 = vpop.f32.mrb[40].mxu1 }
 0xd9e   :  { %v5363_v5 = vpop.f32.mrb[41].mxu1  ;;  %5382 = vmatmul.mubr.msk.f32.vlgmr.msra.gmra.mrb[44].mxu1 %vm1110_vm3, %v3760_v4 }
 0xd9f   :  { %5390 = vmatpush3.msra.mxu1 %v4689_v2  ;;  %5391 = vmatprep.mubr.msk.f32.mxu1 %vm5744_vm0, %v5745_v6  ;;  %v5662_v2 = vpack.c.bf16 %v4714_v1, %v4713_v0 }
 0xda0   :  { %5643 = vmatprep.subr.bf16.mxu1 %v5743_v3 }
 0xda5   :  { %v3906_v7 = vpop.f32.mrb[42].mxu1 }
 0xda6   :  { %v5373_v8 = vpop.f32.mrb[43].mxu1  ;;  %5392 = vmatmul.mubr.msk.f32.vlgmr.msra.gmra.mrb[46].mxu1 %vm1110_vm3, %v3906_v7 }
 0xda7   :  { %5437 = vmatprep.mubr.msk.f32.mxu1 %vm5744_vm0, %v5745_v6  ;;  %5645 = vmatpush3.bf16.msra.mxu1 %v5644_v48  ;;  %v4236_v8 = vrot.slane %v6640_v23, %v2080_v12  ;;  %v4716_v12 = vld [vmem:[%s6779_s8 + $0xf8] sm:$0xff] }
 0xda8   :  { %5646 = vmatprep.subr.bf16.mxu1 %v5743_v3 }
 0xdab   :  { %5648 = vmatpush3.bf16.msra.mxu1 %v5647_v50 }
 0xdac   :  { %5649 = vmatprep.subr.bf16.mxu1 %v5743_v3 }
 0xdaf   :  { %5651 = vmatpush3.bf16.msra.mxu1 %v5650_v52 }
 0xdb0   :  { %5652 = vmatprep.subr.bf16.mxu1 %v5743_v3 }
 0xdb3   :  { %5654 = vmatpush3.bf16.msra.mxu1 %v5653_v55 }
 0xdb4   :  { %5655 = vmatprep.subr.bf16.mxu1 %v5743_v3 }
 0xdb7   :  { %5657 = vmatpush3.bf16.msra.mxu1 %v5656_v57 }
 0xdb8   :  { %5658 = vmatprep.subr.bf16.mxu1 %v5743_v3 }
 0xdbb   :  { %5660 = vmatpush3.bf16.msra.mxu1 %v5659_v63 }
 0xdbc   :  { %5661 = vmatprep.subr.bf16.mxu1 %v5743_v3 }
 0xdbf   :  { %5663 = vmatpush3.bf16.msra.mxu1 %v5662_v2 }
 0xdc0   :  { %5664 = vmatprep.subr.bf16.mxu1 %v5743_v3 }
 0xe51   :  { %v3984_v29 = vpop.f32.mrb[50].mxu0 }
 0xe52   :  { %v5378_v10 = vpop.f32.mrb[51].mxu0  ;;  %v4207_v16 = vsel %vm266_vm2, %v3984_v29, 0.0 }
 0xe5e   :  { %v4130_v11 = vpop.f32.mrb[52].mxu0 }
 0xe5f   :  { %v5388_v14 = vpop.f32.mrb[53].mxu0  ;;  %v4210_v21 = vsel %vm266_vm2, %v4130_v11, 0.0  ;;  %v4241_v11 = vrot.slane %v6640_v23, %v2085_v13  ;;  %v4699_v13 = vld [vmem:[%s6778_s7 + $0x1] ss:$0 sm:$0xff] }
 0xe71   :  { %v4057_v15 = vpop.f32.mrb[44].mxu1 }
 0xe72   :  { %v4208_v17 = vsel %vm266_vm2, %v4057_v15, 0.0  ;;  %v5383_v18 = vpop.f32.mrb[45].mxu1 }
 0xe73   :  { %v4209_v19 = vadd.f32 %v4208_v17, %v4207_v16  ;;  %v4715_v16 = vld [vmem:[%s6779_s8 + $0xf0] sm:$0xff] }
 0xe74   :  { %v5665_v17 = vpack.c.bf16 %v4716_v12, %v4715_v16 }
 0xe75   :  { %v4211_v22 = vadd.f32 %v4210_v21, %v4209_v19 }
 0xe76   :  { %5666 = vmatpush3.bf16.msra.mxu1 %v5665_v17 }
 0xe79   :  { %v4203_v24 = vpop.f32.mrb[46].mxu1 }
 0xe7a   :  { %v4212_v27 = vsel %vm266_vm2, %v4203_v24, 0.0  ;;  %v5393_v28 = vpop.f32.mrb[47].mxu1 }
 0xe7b   :  { %v4213_v30 = vadd.f32 %v4212_v27, %v4211_v22 }
 0xe7d   :  { %v4218_v32 = vadd.f32 %v4217_v25, %v4213_v30 }
 0xe7f   :  { %v4219_v33 = vadd.f32 %v4218_v32, %v6345_v9  ;;  %v4696_v9 = vld [vmem:[%s6777_s6 + $0x30] sm:$0xff] }
 0xe80   :  { %v5641_v45 = vpack.c.bf16 %v4697_v44, %v4696_v9 }
 0xe81   :  { %v4220_v34 = vsel %vm266_vm2, %v4219_v33, 0.0 }
 0xe82   :  { %4221 = vadd.xlane.f32.xlu0 %v4220_v34  ;;  %5642 = vmatpush3.bf16.msra.mxu0 %v5641_v45  ;;  %v4438_v45 = vrot.slane %v6640_v23, %v2279_v58 }
 0xe83   :  { %5667 = vmatprep.subr.bf16.mxu0 %v5743_v3 }
 0xf0f   :  { %v4222_v35 = vpop.xlane.xlu0 %4221 }
 0xf10   :  { %v4223_v36 = vmul.f32 0.03125, %v4222_v35 }
 0xf12   :  { %v4224_v37 = vsub.f32 %v4219_v33, %v4223_v36 }
 0xf14   :  { %v4225_v40 = vmul.f32 %v4224_v37, %v4224_v37 }
 0xf16   :  { %v4226_v41 = vsel %vm266_vm2, %v4225_v40, 0.0 }
 0xf17   :  { %4227 = vadd.xlane.f32.xlu1 %v4226_v41  ;;  %v4447_v41 = vld [vmem:[%s6781_s10 + $0x10] sm:$0xff] }
 0xf18   :  { %v5671_v42 = vpack.c.bf16 %v4448_v26, %v4447_v41 }
 0xfa4   :  { %v4228_v4 = vpop.xlane.xlu1 %4227 }
 0xfa5   :  { %v4229_v5 = vmul.f32 0.03125, %v4228_v4 }
 0xfa7   :  { %v4230_v7 = vadd.f32 1e-05, %v4229_v5 }
 0xfa9   :  { %5713 = vrsqrt.f32 %v4230_v7 }
 0xfb3   :  { %v5714_v29 = vpop.eup %5713 }
 0xfb4   :  { %v4232_v10 = vmul.f32 %v5714_v29, %v4224_v37  ;;  %v4445_v37 = vld [vmem:[%s6781_s10] sm:$0xff] }
 0xfb6   :  { %v4237_v14 = vmul.f32 %v4236_v8, %v4232_v10 }
 0xfb8   :  { %v4242_v15 = vadd.f32 %v4241_v11, %v4237_v14 }
 0xfba   :  { %5403 = vmatmul.mubr.msk.f32.vlgmr.msra.gmra.mrb[54].mxu0 %vm266_vm2, %v4242_v15 }
 0xfbb   :  { %5448 = vmatprep.mubr.msk.f32.mxu0 %vm5744_vm0, %v5745_v6  ;;  %v4350_v6 = vrot.slane %v6640_v23, %v2191_v31  ;;  %v4446_v31 = vld [vmem:[%s6781_s10 + $0x8] sm:$0xff] }
 0xfbc   :  { %v5668_v40 = vpack.c.bf16 %v4446_v31, %v4445_v37 }
 0xfbe   :  { %5669 = vmatpush3.bf16.msra.mxu0 %v5668_v40 }
 0xfbf   :  { %5670 = vmatprep.subr.bf16.mxu0 %v5743_v3 }
 0xfc2   :  { %5672 = vmatpush3.bf16.msra.mxu0 %v5671_v42 }
0x108d   :  { %v4325_v18 = vpop.f32.mrb[54].mxu0 }
0x108e   :  { %v4326_v19 = vadd.f32 %v4699_v13, %v4325_v18  ;;  %v5404_v21 = vpop.f32.mrb[55].mxu0 }
0x1090   :  { %v4329_v22 = vmax.f32 %v4326_v19, 0.0 }
0x1092   :  { %5438 = vmatmul.mubr.f32.vlgmr.msra.gmra.mrb[48].mxu1 %v4329_v22 }
0x1165   :  { %v4417_v24 = vpop.f32.mrb[48].mxu1 }
0x1166   :  { %v4418_v25 = vadd.f32 %v4417_v24, %v4350_v6  ;;  %v5439_v27 = vpop.f32.mrb[49].mxu1 }
0x1168   :  { %v4421_v28 = vadd.f32 %v4418_v25, %v4242_v15 }
0x116a   :  { %v4422_v30 = vsel %vm266_vm2, %v4421_v28, 0.0 }
0x116b   :  { %4423 = vadd.xlane.f32.xlu0 %v4422_v30 }
0x11f8   :  { %v4424_v32 = vpop.xlane.xlu0 %4423 }
0x11f9   :  { %v4425_v33 = vmul.f32 0.03125, %v4424_v32 }
0x11fb   :  { %v4426_v34 = vsub.f32 %v4421_v28, %v4425_v33 }
0x11fd   :  { %v4427_v35 = vmul.f32 %v4426_v34, %v4426_v34 }
0x11ff   :  { %v4428_v36 = vsel %vm266_vm2, %v4427_v35, 0.0 }
0x1200   :  { %4429 = vadd.xlane.f32.xlu1 %v4428_v36 }
0x128d   :  { %v4430_v43 = vpop.xlane.xlu1 %4429 }
0x128e   :  { %v4431_v9 = vmul.f32 0.03125, %v4430_v43 }
0x1290   :  { %v4432_v44 = vadd.f32 1e-05, %v4431_v9 }
0x1292   :  { %5715 = vrsqrt.f32 %v4432_v44 }
0x129c   :  { %v5716_v46 = vpop.eup %5715 }
0x129d   :  { %v4434_v3 = vmul.f32 %v5716_v46, %v4426_v34 }
0x129f   :  { %v4439_v38 = vmul.f32 %v4438_v45, %v4434_v3 }
0x12a1   :  { %v4444_v48 = vadd.f32 %v4443_v47, %v4439_v38 }
0x12a3   :  { %5449 = vmatmul.mubr.msk.f32.vlgmr.msra.gmra.mrb[56].mxu0 %vm266_vm2, %v4444_v48 }
0x1376   :  { %v4525_v50 = vpop.f32.mrb[56].mxu0 }
0x1377   :  { %v4526_v39 = vadd.f32 %v4717_v49, %v4525_v50  ;;  %v5450_v51 = vpop.f32.mrb[57].mxu0 }
0x1379   :  { %5717 = vtanh.f32 %v4526_v39 }
0x1383   :  { %v5718_v58 = vpop.eup %5717 }
0x1384   :  { %4530 = vst.msk [vmem:[#allocation2] sm:$0xff] %vm58_vm1, %v5718_v58 }
0x1385   :  { %5730 = shalt.err (!%p5727_p4)
}
0x1386   :  { %s5731_s11 = scalar_lea.hbm %s6783_s12, 128 }
0x1387   :  { %p5732_p5 = scmp.ne.s32.totalorder %s6783_s12, %s5731_s11  ;;  %p5735_p6 = scmp.lt.u32.totalorder %s5731_s11, %s6783_s12 }
0x1389   :  { %p5737_p7 = pnand %p5735_p6, %p5732_p5 }
0x138b   :  { %5740 = shalt.err (!%p5737_p7)
}
0x138c   :  { %4540 = dma.vmem_to_hbm [thread:$0]  %s4538_s5, 128, %s6783_s12, [#allocation3]  }
0x138d   :  { %5741 = dma.done.wait [#allocation3], 128  }
0x138e   :  { %5742 = vsyncadd [#allocation3], 4294967168 }
0x138f   :  { %4544 = vsyncpa [#allocation3], 1 }

</bundles_post_ra>
